<compile_context>
chip_gen: v5e
topology: v5e:2x2
jax: 0.10.0
libtpu: 0.0.40
codegen_flags: <defaults>
</compile_context>

<pallas_src>
import functools
import math

import jax
import jax.numpy as jnp
from jax.experimental import pallas as pl
from jax.experimental.pallas import tpu as pltpu

BN_EPS = 1e-5
LANE = 128

_VMEM = pl.BlockSpec(memory_space=pltpu.MemorySpace.VMEM)


def _round_up(x, m):
    return (x + m - 1) // m * m


# ----------------------------- Pallas kernels -----------------------------

def _conv_block_kernel(xs_ref, w_ref, g_ref, beta_ref, mask_ref, o_ref, xp_ref, *,
                       cin, k, pk, ps, wh, nbatch, mext_pad, inv_count):
    """Fused Conv2d + BatchNorm2d(batch stats) + ReLU + MaxPool2d for one block.

    Layouts (channels on sublanes, (h, w, n) pixels on lanes):
      xs   : (ps*ps*cin, mext_pad)      bf16  pool-phase-decimated input,
             row = (r0*ps + s0)*cin + c, col = (qh*wh + qw)*nbatch + n (zero pad)
      w    : (cout, kkc_pad)            bf16  folded conv weight, col = (ky, kx, c)
      g/b  : (cout, 1)                  f32   BN affine parameters
      mask : (1, n_pool*mext_pad)       f32   1.0 on real conv-output pixels
      out  : (cout, mext_pad)           f32   pooled activations (lane-dense store)
      xp   : (kkc_pad, n_pool*mext_pad) bf16  VMEM scratch, im2col patches built
             fully in-kernel (no K^2-amplified HBM traffic).
    """
    # Zero the scratch once: pad rows / unwritten tails must be 0.0 (never NaN
    # garbage) so they are exact no-ops in the matmul and masked BN statistics.
    xp_ref[...] = jnp.zeros_like(xp_ref)

    # In-kernel im2col: each (pool_tap, ky, kx) patch is a lane-shifted copy of one
    # pool-phase row block of xs (shift = halo offset inside the decimated grid).
    # All slices/offsets are static; identical (phase, shift) reads are cached.
    phase_cache = {}
    for py in range(pk):
        for px in range(pk):
            col_off = (py * pk + px) * mext_pad
            for ky in range(k):
                for kx in range(k):
                    r, s = py + ky, px + kx
                    r0, q = r % ps, r // ps
                    s0, q2 = s % ps, s // ps
                    sh = (q * wh + q2) * nbatch          # static lane shift
                    key = (r0, s0, sh)
                    if key not in phase_cache:
                        p_row = (r0 * ps + s0) * cin
                        phase_cache[key] = xs_ref[p_row:p_row + cin, sh:]
                    val = phase_cache[key]               # (cin, mext_pad - sh)
                    row_off = (ky * k + kx) * cin
                    xp_ref[row_off:row_off + cin,
                           col_off:col_off + (mext_pad - sh)] = val

    # One folded MXU matmul: contraction depth kkc_pad, f32 accumulation.
    acc = jnp.dot(w_ref[...], xp_ref[...], preferred_element_type=jnp.float32)

    # Single-pass masked batch statistics over exactly the real conv-output pixels
    # (lane reduce -> XLU), folded into one scale/shift FMA.  The conv bias is
    # omitted: an exact no-op under training-mode (batch-stat) BatchNorm.
    am = acc * mask_ref[...]
    mean = jnp.sum(am, axis=1, keepdims=True) * inv_count
    ex2 = jnp.sum(am * am, axis=1, keepdims=True) * inv_count
    var = jnp.maximum(ex2 - mean * mean, 0.0)            # clamp: cancellation safety
    scale = g_ref[...] * jax.lax.rsqrt(var + BN_EPS)     # rsqrt -> EUP slot
    shift = beta_ref[...] - scale * mean
    y = jnp.maximum(acc * scale + shift, 0.0)            # BN + ReLU, one VPU pass

    # Fused MaxPool: max over the pk*pk pool-tap column blocks.  Each block is
    # mext_pad (multiple of 128) wide -> every slice is lane-tile aligned and the
    # final store is an unmasked, lane-dense vst.
    pooled = y[:, 0:mext_pad]
    for t in range(1, pk * pk):                           # static unroll (<= 4)
        pooled = jnp.maximum(pooled, y[:, t * mext_pad:(t + 1) * mext_pad])
    o_ref[...] = pooled


def _mlp_head_kernel(*refs, n_layers):
    """Fused FC head, features on sublanes / batch on lanes:
    y = relu(W1 @ x + b1) -> ... -> Wn @ y + bn (no ReLU on last).
    refs = (x, w1, b1, ..., wn, bn, out); bf16 MXU inputs, f32 accumulation."""
    x_ref, o_ref = refs[0], refs[-1]
    y = x_ref[...]
    for i in range(n_layers):
        w_ref, b_ref = refs[1 + 2 * i], refs[2 + 2 * i]
        y = jnp.dot(w_ref[...], y, preferred_element_type=jnp.float32) + b_ref[...]
        if i < n_layers - 1:
            y = jnp.maximum(y, 0.0).astype(jnp.bfloat16)
    o_ref[...] = y


# --------------------------- wrappers / forward -----------------------------

def _phase_split(x_chwn, ps, mext_pad):
    """CHWN activation -> (ps*ps*C, mext_pad) pool-phase-decimated, lane-padded,
    bf16.  This is the only XLA-side layout work per block (~1x input bytes; the
    K^2 im2col duplication now happens in VMEM inside the kernel)."""
    C, H, W, N = x_chwn.shape
    hh, wh = H // ps, W // ps
    xb = x_chwn.astype(jnp.bfloat16)
    xs = xb.reshape(C, hh, ps, wh, ps, N)
    xs = jnp.transpose(xs, (2, 4, 0, 1, 3, 5)).reshape(ps * ps * C, hh * wh * N)
    pad = mext_pad - hh * wh * N
    if pad:
        xs = jnp.pad(xs, ((0, 0), (0, pad)))
    return xs


def conv_block_forward(x_chwn, blk):
    cfg = blk["cfg"]
    K, pk, ps = cfg["conv_kernel"], cfg["pool_kernel"], cfg["pool_stride"]
    # Only the PyTorch defaults for stride/pad/dilation are implemented here.
    assert (cfg["conv_stride"], cfg["conv_pad"], cfg["conv_dilation"]) == (1, 0, 1)
    assert (cfg["pool_pad"], cfg["pool_dilation"]) == (0, 1)

    Cin, H, W, N = x_chwn.shape
    Cout, kkc_pad = blk["w_mx"].shape
    Ho, Wo = H - (K - 1), W - (K - 1)
    if pk == 1:                                  # torch.nn.Identity pool
        pk, ps = 1, 1
    Hp = (Ho - pk) // ps + 1
    Wp = (Wo - pk) // ps + 1
    # Fused BN-over-pool-tap-columns needs the pool taps to tile the conv output
    # exactly, and the pool-phase decimation needs ps | H, W (these conditions also
    # guarantee the in-kernel lane-shift patch extraction never wraps).
    # TODO(synk): general pool configs need a separate full-pixel BN stats pass.
    assert pk == ps and Ho == Hp * ps and Wo == Wp * ps
    assert H % ps == 0 and W % ps == 0

    hh, wh = H // ps, W // ps
    mext = hh * wh * N
    mext_pad = _round_up(mext, LANE)
    n_pool = pk * pk

    xs = _phase_split(x_chwn, ps, mext_pad)

    # Valid-pixel mask (shape-only -> constant-folded by XLA): a column (qh, qw, n)
    # of a pool-tap block is a real conv-output pixel iff qh < Hp and qw < Wp.
    col = jnp.arange(mext_pad)
    qh, qw = (col // N) // wh, (col // N) % wh
    valid = ((col < mext) & (qh < Hp) & (qw < Wp)).astype(jnp.float32)
    mask = jnp.tile(valid, n_pool).reshape(1, n_pool * mext_pad)

    # TODO(synk): at production sizes, grid over the lane axis (sum/sum-sq BN
    # carry), mark it "parallel" for v7x's second TensorCore, and budget the tile
    # against ~48 MiB usable VMEM on v7x (>=512-lane tiles on v5e/v6e).
    out = pl.pallas_call(
        functools.partial(
            _conv_block_kernel, cin=Cin, k=K, pk=pk, ps=ps, wh=wh, nbatch=N,
            mext_pad=mext_pad, inv_count=1.0 / float(N * Ho * Wo)),
        out_shape=jax.ShapeDtypeStruct((Cout, mext_pad), jnp.float32),
        in_specs=[_VMEM] * 5,
        out_specs=_VMEM,
        scratch_shapes=[pltpu.VMEM((kkc_pad, n_pool * mext_pad), jnp.bfloat16)],
    )(xs, blk["w_mx"], blk["gamma2d"], blk["beta2d"], mask)
    # Crop the decimated-grid halo / lane pad; stays CHWN for the next block.
    return out[:, :mext].reshape(Cout, hh, wh, N)[:, :Hp, :Wp, :]


def mlp_head(x_feat_n, fc_blocks, final):
    """x_feat_n: (Din, N) activations in PyTorch (c, h, w) feature order, batch on
    lanes.  Weights are used in their native (Dout, Din) orientation (no transpose)."""
    wb = []
    for fc in fc_blocks:
        wb += [fc["w_bf16"], fc["b2d"]]
    wb += [final["w_bf16"], final["b2d"]]
    n_layers = len(fc_blocks) + 1
    n_latent = final["w_bf16"].shape[0]
    out = pl.pallas_call(
        functools.partial(_mlp_head_kernel, n_layers=n_layers),
        out_shape=jax.ShapeDtypeStruct((n_latent, x_feat_n.shape[1]), jnp.float32),
        in_specs=[_VMEM] * (1 + len(wb)),
        out_specs=_VMEM,
    )(x_feat_n.astype(jnp.bfloat16), *wb)
    return out.T                                   # (N, n_latent), tiny transpose


def convnet_enc_forward(x_nchw, params):
    # NCHW -> CHWN once: channels on sublanes, (h, w, n) pixels on lanes end-to-end.
    x = jnp.transpose(x_nchw, (1, 2, 3, 0))
    for blk in params["conv_blocks"]:
        x = conv_block_forward(x, blk)
    C, Hp, Wp, N = x.shape
    # Contiguous reshape straight into PyTorch's (c, h, w) flatten order with batch
    # on lanes: no activation relayout between the conv stack and the FC head.
    return mlp_head(x.reshape(C * Hp * Wp, N), params["fc_blocks"], params["final"])


# ----------------------------- parameter setup -----------------------------

def _uniform(key, shape, bound):
    return jax.random.uniform(key, shape, jnp.float32, -bound, bound)


def init_params(key, layers, input_shape, n_latent):
    defaults = dict(conv_kernel=5, conv_pad=0, conv_dilation=1, conv_stride=1,
                    pool_kernel=2, pool_pad=0, pool_dilation=1, pool_stride=2)
    params = {"conv_blocks": [], "fc_blocks": [], "final": None}
    c, h, w = input_shape
    i = 0
    while i < len(layers) and "fully_connected" not in layers[i]:
        cfg = dict(defaults)
        cfg.update(layers[i])
        cout, K = cfg["out_channels"], cfg["conv_kernel"]
        key, k1, k2 = jax.random.split(key, 3)
        bound = 1.0 / math.sqrt(c * K * K)
        wt = _uniform(k1, (cout, c, K, K), bound)
        gamma = jnp.ones((cout,), jnp.float32)
        beta = jnp.zeros((cout,), jnp.float32)
        kkc = K * K * c
        kkc_pad = _round_up(kkc, 16)            # dense bf16 vreg packing for the MXU
        w_fold = jnp.transpose(wt, (0, 2, 3, 1)).reshape(cout, kkc)
        w_fold = jnp.pad(w_fold, ((0, 0), (0, kkc_pad - kkc)))
        params["conv_blocks"].append(dict(
            cfg=cfg,
            w=wt,                                    # OIHW, used by the reference
            b=_uniform(k2, (cout,), bound),          # reference only (no-op under BN)
            gamma=gamma, beta=beta,
            # Pre-folded kernel-side tensors, built once at init (not per call):
            w_mx=w_fold.astype(jnp.bfloat16),        # (cout, kkc_pad), cols (ky,kx,c)
            gamma2d=gamma.reshape(cout, 1),
            beta2d=beta.reshape(cout, 1)))
        ho, wo = h - (K - 1), w - (K - 1)
        if cfg["pool_kernel"] == 1:
            h, w = ho, wo
        else:
            h = (ho - (cfg["pool_kernel"] - 1) - 1) // cfg["pool_stride"] + 1
            w = (wo - (cfg["pool_kernel"] - 1) - 1) // cfg["pool_stride"] + 1
        c = cout
        i += 1
    din = c * h * w
    while i < len(layers):
        dout = layers[i]["fully_connected"]
        key, k1, k2 = jax.random.split(key, 3)
        bound = 1.0 / math.sqrt(din)
        wt = _uniform(k1, (dout, din), bound)
        b = _uniform(k2, (dout,), bound)
        params["fc_blocks"].append(dict(w=wt, b=b,
                                        w_bf16=wt.astype(jnp.bfloat16),
                                        b2d=b.reshape(dout, 1)))
        din = dout
        i += 1
    key, k1, k2 = jax.random.split(key, 3)
    bound = 1.0 / math.sqrt(din)
    wt = _uniform(k1, (n_latent, din), bound)
    b = _uniform(k2, (n_latent,), bound)
    params["final"] = dict(w=wt, b=b, w_bf16=wt.astype(jnp.bfloat16),
                           b2d=b.reshape(n_latent, 1))
    return params


# ----------------------------- pure-JAX reference ---------------------------

def reference_forward(x, params, matmul_dtype=jnp.float32):
    """PyTorch-equivalent reference.  matmul_dtype=bfloat16 reproduces the kernel's
    MXU input precision (f32 accumulation) for a tight numerical comparison."""
    for blk in params["conv_blocks"]:
        cfg = blk["cfg"]
        y = jax.lax.conv_general_dilated(
            x.astype(matmul_dtype), blk["w"].astype(matmul_dtype),
            window_strides=(1, 1), padding="VALID",
            dimension_numbers=("NCHW", "OIHW", "NCHW"),
            preferred_element_type=jnp.float32)
        y = y + blk["b"][None, :, None, None]
        mean = jnp.mean(y, axis=(0, 2, 3), keepdims=True)
        var = jnp.mean((y - mean) ** 2, axis=(0, 2, 3), keepdims=True)
        y = (blk["gamma"][None, :, None, None] * (y - mean)
             * jax.lax.rsqrt(var + BN_EPS) + blk["beta"][None, :, None, None])
        y = jnp.maximum(y, 0.0)
        pk, ps = cfg["pool_kernel"], cfg["pool_stride"]
        if pk > 1:
            x = jax.lax.reduce_window(y, -jnp.inf, jax.lax.max,
                                      (1, 1, pk, pk), (1, 1, ps, ps), "VALID")
        else:
            x = y
    x = x.reshape(x.shape[0], -1)
    for fc in params["fc_blocks"]:
        x = jnp.maximum(
            jnp.dot(x.astype(matmul_dtype), fc["w"].T.astype(matmul_dtype),
                    preferred_element_type=jnp.float32) + fc["b"], 0.0)
    pf = params["final"]
    return jnp.dot(x.astype(matmul_dtype), pf["w"].T.astype(matmul_dtype),
                   preferred_element_type=jnp.float32) + pf["b"]


# ----------------------------------- main -----------------------------------

if __name__ == "__main__":
    layers = [{"out_channels": 8, "conv_kernel": 5},
              {"out_channels": 16, "conv_kernel": 3},
              {"fully_connected": 32}]
    input_shape = (4, 16, 16)   # (C, H, W)
    n_latent = 10
    batch = 2

    key = jax.random.PRNGKey(0)
    kx, kp = jax.random.split(key)
    x = jax.random.normal(kx, (batch,) + input_shape, jnp.float32)
    params = init_params(kp, layers, input_shape, n_latent)

    fwd = jax.jit(lambda xin: convnet_enc_forward(xin, params))
    out = jax.block_until_ready(fwd(x))
    assert out.shape == (batch, n_latent), out.shape

    # Tight check against a reference run at the same (bf16-input, f32-accumulate)
    # matmul precision as the kernels.
    ref_mx = reference_forward(x, params, matmul_dtype=jnp.bfloat16)
    err_mx = float(jnp.max(jnp.abs(out - ref_mx)))
    assert jnp.allclose(out, ref_mx, atol=1e-2, rtol=1e-2), \
        f"max abs diff (matched precision) = {err_mx}"
    # Looser sanity check against exact f32 PyTorch math (bf16 matmul-input
    # quantization is the only systematic difference).
    ref_f32 = reference_forward(x, params, matmul_dtype=jnp.float32)
    err_f32 = float(jnp.max(jnp.abs(out - ref_f32)))
    assert jnp.allclose(out, ref_f32, atol=1e-1, rtol=1e-1), \
        f"max abs diff (f32 reference) = {err_f32}"
    print("KERNEL_OK")
</pallas_src>

<mosaic_0001>
module attributes {stable_mosaic.version = 11 : i64} {
  func.func @_conv_block_kernel(%arg0: memref<16x128xbf16, #tpu.memory_space<vmem>>, %arg1: memref<8x112xbf16, #tpu.memory_space<vmem>>, %arg2: memref<8x1xf32, #tpu.memory_space<vmem>>, %arg3: memref<8x1xf32, #tpu.memory_space<vmem>>, %arg4: memref<1x512xf32, #tpu.memory_space<vmem>>, %arg5: memref<8x128xf32, #tpu.memory_space<vmem>>, %arg6: memref<112x512xbf16, #tpu.memory_space<vmem>>) attributes {dimension_semantics = [], scalar_prefetch = 0 : i64, scratch_operands = 1 : i64, tpu.core_type = #tpu.core_type<tc>} {
    %cst = arith.constant 0.000000e+00 : bf16
    %0 = vector.broadcast %cst : bf16 to vector<112x512xbf16>
    %c0 = arith.constant 0 : index
    %c0_0 = arith.constant 0 : index
    %1 = vector.load %arg6[%c0, %c0_0] : memref<112x512xbf16, #tpu.memory_space<vmem>>, vector<112x512xbf16>
    tpu.vector_store %arg6[%c0, %c0_0], %0 {strides = array<i32>} : memref<112x512xbf16, #tpu.memory_space<vmem>>, vector<112x512xbf16>,
    %c0_1 = arith.constant 0 : index
    %c0_2 = arith.constant 0 : index
    %2 = vector.load %arg0[%c0_1, %c0_2] : memref<16x128xbf16, #tpu.memory_space<vmem>>, vector<4x128xbf16>
    %c0_3 = arith.constant 0 : index
    %c0_4 = arith.constant 0 : index
    %3 = vector.load %arg6[%c0_3, %c0_4] : memref<112x512xbf16, #tpu.memory_space<vmem>>, vector<4x128xbf16>
    tpu.vector_store %arg6[%c0_3, %c0_4], %2 {strides = array<i32>} : memref<112x512xbf16, #tpu.memory_space<vmem>>, vector<4x128xbf16>,
    %c4 = arith.constant 4 : index
    %c0_5 = arith.constant 0 : index
    %4 = vector.load %arg0[%c4, %c0_5] : memref<16x128xbf16, #tpu.memory_space<vmem>>, vector<4x128xbf16>
    %c4_6 = arith.constant 4 : index
    %c0_7 = arith.constant 0 : index
    %5 = vector.load %arg6[%c4_6, %c0_7] : memref<112x512xbf16, #tpu.memory_space<vmem>>, vector<4x128xbf16>
    tpu.vector_store %arg6[%c4_6, %c0_7], %4 {strides = array<i32>} : memref<112x512xbf16, #tpu.memory_space<vmem>>, vector<4x128xbf16>,
    %c0_8 = arith.constant 0 : index
    %c2 = arith.constant 2 : index
    %6 = vector.load %arg0[%c0_8, %c2] : memref<16x128xbf16, #tpu.memory_space<vmem>>, vector<4x126xbf16>
    %c8 = arith.constant 8 : index
    %c0_9 = arith.constant 0 : index
    %7 = vector.load %arg6[%c8, %c0_9] : memref<112x512xbf16, #tpu.memory_space<vmem>>, vector<4x126xbf16>
    tpu.vector_store %arg6[%c8, %c0_9], %6 {strides = array<i32>} : memref<112x512xbf16, #tpu.memory_space<vmem>>, vector<4x126xbf16>,
    %c4_10 = arith.constant 4 : index
    %c2_11 = arith.constant 2 : index
    %8 = vector.load %arg0[%c4_10, %c2_11] : memref<16x128xbf16, #tpu.memory_space<vmem>>, vector<4x126xbf16>
    %c12 = arith.constant 12 : index
    %c0_12 = arith.constant 0 : index
    %9 = vector.load %arg6[%c12, %c0_12] : memref<112x512xbf16, #tpu.memory_space<vmem>>, vector<4x126xbf16>
    tpu.vector_store %arg6[%c12, %c0_12], %8 {strides = array<i32>} : memref<112x512xbf16, #tpu.memory_space<vmem>>, vector<4x126xbf16>,
    %c0_13 = arith.constant 0 : index
    %c4_14 = arith.constant 4 : index
    %10 = vector.load %arg0[%c0_13, %c4_14] : memref<16x128xbf16, #tpu.memory_space<vmem>>, vector<4x124xbf16>
    %c16 = arith.constant 16 : index
    %c0_15 = arith.constant 0 : index
    %11 = vector.load %arg6[%c16, %c0_15] : memref<112x512xbf16, #tpu.memory_space<vmem>>, vector<4x124xbf16>
    tpu.vector_store %arg6[%c16, %c0_15], %10 {strides = array<i32>} : memref<112x512xbf16, #tpu.memory_space<vmem>>, vector<4x124xbf16>,
    %c8_16 = arith.constant 8 : index
    %c0_17 = arith.constant 0 : index
    %12 = vector.load %arg0[%c8_16, %c0_17] : memref<16x128xbf16, #tpu.memory_space<vmem>>, vector<4x128xbf16>
    %c20 = arith.constant 20 : index
    %c0_18 = arith.constant 0 : index
    %13 = vector.load %arg6[%c20, %c0_18] : memref<112x512xbf16, #tpu.memory_space<vmem>>, vector<4x128xbf16>
    tpu.vector_store %arg6[%c20, %c0_18], %12 {strides = array<i32>} : memref<112x512xbf16, #tpu.memory_space<vmem>>, vector<4x128xbf16>,
    %c12_19 = arith.constant 12 : index
    %c0_20 = arith.constant 0 : index
    %14 = vector.load %arg0[%c12_19, %c0_20] : memref<16x128xbf16, #tpu.memory_space<vmem>>, vector<4x128xbf16>
    %c24 = arith.constant 24 : index
    %c0_21 = arith.constant 0 : index
    %15 = vector.load %arg6[%c24, %c0_21] : memref<112x512xbf16, #tpu.memory_space<vmem>>, vector<4x128xbf16>
    tpu.vector_store %arg6[%c24, %c0_21], %14 {strides = array<i32>} : memref<112x512xbf16, #tpu.memory_space<vmem>>, vector<4x128xbf16>,
    %c8_22 = arith.constant 8 : index
    %c2_23 = arith.constant 2 : index
    %16 = vector.load %arg0[%c8_22, %c2_23] : memref<16x128xbf16, #tpu.memory_space<vmem>>, vector<4x126xbf16>
    %c28 = arith.constant 28 : index
    %c0_24 = arith.constant 0 : index
    %17 = vector.load %arg6[%c28, %c0_24] : memref<112x512xbf16, #tpu.memory_space<vmem>>, vector<4x126xbf16>
    tpu.vector_store %arg6[%c28, %c0_24], %16 {strides = array<i32>} : memref<112x512xbf16, #tpu.memory_space<vmem>>, vector<4x126xbf16>,
    %c12_25 = arith.constant 12 : index
    %c2_26 = arith.constant 2 : index
    %18 = vector.load %arg0[%c12_25, %c2_26] : memref<16x128xbf16, #tpu.memory_space<vmem>>, vector<4x126xbf16>
    %c32 = arith.constant 32 : index
    %c0_27 = arith.constant 0 : index
    %19 = vector.load %arg6[%c32, %c0_27] : memref<112x512xbf16, #tpu.memory_space<vmem>>, vector<4x126xbf16>
    tpu.vector_store %arg6[%c32, %c0_27], %18 {strides = array<i32>} : memref<112x512xbf16, #tpu.memory_space<vmem>>, vector<4x126xbf16>,
    %c8_28 = arith.constant 8 : index
    %c4_29 = arith.constant 4 : index
    %20 = vector.load %arg0[%c8_28, %c4_29] : memref<16x128xbf16, #tpu.memory_space<vmem>>, vector<4x124xbf16>
    %c36 = arith.constant 36 : index
    %c0_30 = arith.constant 0 : index
    %21 = vector.load %arg6[%c36, %c0_30] : memref<112x512xbf16, #tpu.memory_space<vmem>>, vector<4x124xbf16>
    tpu.vector_store %arg6[%c36, %c0_30], %20 {strides = array<i32>} : memref<112x512xbf16, #tpu.memory_space<vmem>>, vector<4x124xbf16>,
    %c0_31 = arith.constant 0 : index
    %c16_32 = arith.constant 16 : index
    %22 = vector.load %arg0[%c0_31, %c16_32] : memref<16x128xbf16, #tpu.memory_space<vmem>>, vector<4x112xbf16>
    %c40 = arith.constant 40 : index
    %c0_33 = arith.constant 0 : index
    %23 = vector.load %arg6[%c40, %c0_33] : memref<112x512xbf16, #tpu.memory_space<vmem>>, vector<4x112xbf16>
    tpu.vector_store %arg6[%c40, %c0_33], %22 {strides = array<i32>} : memref<112x512xbf16, #tpu.memory_space<vmem>>, vector<4x112xbf16>,
    %c4_34 = arith.constant 4 : index
    %c16_35 = arith.constant 16 : index
    %24 = vector.load %arg0[%c4_34, %c16_35] : memref<16x128xbf16, #tpu.memory_space<vmem>>, vector<4x112xbf16>
    %c44 = arith.constant 44 : index
    %c0_36 = arith.constant 0 : index
    %25 = vector.load %arg6[%c44, %c0_36] : memref<112x512xbf16, #tpu.memory_space<vmem>>, vector<4x112xbf16>
    tpu.vector_store %arg6[%c44, %c0_36], %24 {strides = array<i32>} : memref<112x512xbf16, #tpu.memory_space<vmem>>, vector<4x112xbf16>,
    %c0_37 = arith.constant 0 : index
    %c18 = arith.constant 18 : index
    %26 = vector.load %arg0[%c0_37, %c18] : memref<16x128xbf16, #tpu.memory_space<vmem>>, vector<4x110xbf16>
    %c48 = arith.constant 48 : index
    %c0_38 = arith.constant 0 : index
    %27 = vector.load %arg6[%c48, %c0_38] : memref<112x512xbf16, #tpu.memory_space<vmem>>, vector<4x110xbf16>
    tpu.vector_store %arg6[%c48, %c0_38], %26 {strides = array<i32>} : memref<112x512xbf16, #tpu.memory_space<vmem>>, vector<4x110xbf16>,
    %c4_39 = arith.constant 4 : index
    %c18_40 = arith.constant 18 : index
    %28 = vector.load %arg0[%c4_39, %c18_40] : memref<16x128xbf16, #tpu.memory_space<vmem>>, vector<4x110xbf16>
    %c52 = arith.constant 52 : index
    %c0_41 = arith.constant 0 : index
    %29 = vector.load %arg6[%c52, %c0_41] : memref<112x512xbf16, #tpu.memory_space<vmem>>, vector<4x110xbf16>
    tpu.vector_store %arg6[%c52, %c0_41], %28 {strides = array<i32>} : memref<112x512xbf16, #tpu.memory_space<vmem>>, vector<4x110xbf16>,
    %c0_42 = arith.constant 0 : index
    %c20_43 = arith.constant 20 : index
    %30 = vector.load %arg0[%c0_42, %c20_43] : memref<16x128xbf16, #tpu.memory_space<vmem>>, vector<4x108xbf16>
    %c56 = arith.constant 56 : index
    %c0_44 = arith.constant 0 : index
    %31 = vector.load %arg6[%c56, %c0_44] : memref<112x512xbf16, #tpu.memory_space<vmem>>, vector<4x108xbf16>
    tpu.vector_store %arg6[%c56, %c0_44], %30 {strides = array<i32>} : memref<112x512xbf16, #tpu.memory_space<vmem>>, vector<4x108xbf16>,
    %c8_45 = arith.constant 8 : index
    %c16_46 = arith.constant 16 : index
    %32 = vector.load %arg0[%c8_45, %c16_46] : memref<16x128xbf16, #tpu.memory_space<vmem>>, vector<4x112xbf16>
    %c60 = arith.constant 60 : index
    %c0_47 = arith.constant 0 : index
    %33 = vector.load %arg6[%c60, %c0_47] : memref<112x512xbf16, #tpu.memory_space<vmem>>, vector<4x112xbf16>
    tpu.vector_store %arg6[%c60, %c0_47], %32 {strides = array<i32>} : memref<112x512xbf16, #tpu.memory_space<vmem>>, vector<4x112xbf16>,
    %c12_48 = arith.constant 12 : index
    %c16_49 = arith.constant 16 : index
    %34 = vector.load %arg0[%c12_48, %c16_49] : memref<16x128xbf16, #tpu.memory_space<vmem>>, vector<4x112xbf16>
    %c64 = arith.constant 64 : index
    %c0_50 = arith.constant 0 : index
    %35 = vector.load %arg6[%c64, %c0_50] : memref<112x512xbf16, #tpu.memory_space<vmem>>, vector<4x112xbf16>
    tpu.vector_store %arg6[%c64, %c0_50], %34 {strides = array<i32>} : memref<112x512xbf16, #tpu.memory_space<vmem>>, vector<4x112xbf16>,
    %c8_51 = arith.constant 8 : index
    %c18_52 = arith.constant 18 : index
    %36 = vector.load %arg0[%c8_51, %c18_52] : memref<16x128xbf16, #tpu.memory_space<vmem>>, vector<4x110xbf16>
    %c68 = arith.constant 68 : index
    %c0_53 = arith.constant 0 : index
    %37 = vector.load %arg6[%c68, %c0_53] : memref<112x512xbf16, #tpu.memory_space<vmem>>, vector<4x110xbf16>
    tpu.vector_store %arg6[%c68, %c0_53], %36 {strides = array<i32>} : memref<112x512xbf16, #tpu.memory_space<vmem>>, vector<4x110xbf16>,
    %c12_54 = arith.constant 12 : index
    %c18_55 = arith.constant 18 : index
    %38 = vector.load %arg0[%c12_54, %c18_55] : memref<16x128xbf16, #tpu.memory_space<vmem>>, vector<4x110xbf16>
    %c72 = arith.constant 72 : index
    %c0_56 = arith.constant 0 : index
    %39 = vector.load %arg6[%c72, %c0_56] : memref<112x512xbf16, #tpu.memory_space<vmem>>, vector<4x110xbf16>
    tpu.vector_store %arg6[%c72, %c0_56], %38 {strides = array<i32>} : memref<112x512xbf16, #tpu.memory_space<vmem>>, vector<4x110xbf16>,
    %c8_57 = arith.constant 8 : index
    %c20_58 = arith.constant 20 : index
    %40 = vector.load %arg0[%c8_57, %c20_58] : memref<16x128xbf16, #tpu.memory_space<vmem>>, vector<4x108xbf16>
    %c76 = arith.constant 76 : index
    %c0_59 = arith.constant 0 : index
    %41 = vector.load %arg6[%c76, %c0_59] : memref<112x512xbf16, #tpu.memory_space<vmem>>, vector<4x108xbf16>
    tpu.vector_store %arg6[%c76, %c0_59], %40 {strides = array<i32>} : memref<112x512xbf16, #tpu.memory_space<vmem>>, vector<4x108xbf16>,
    %c0_60 = arith.constant 0 : index
    %c32_61 = arith.constant 32 : index
    %42 = vector.load %arg0[%c0_60, %c32_61] : memref<16x128xbf16, #tpu.memory_space<vmem>>, vector<4x96xbf16>
    %c80 = arith.constant 80 : index
    %c0_62 = arith.constant 0 : index
    %43 = vector.load %arg6[%c80, %c0_62] : memref<112x512xbf16, #tpu.memory_space<vmem>>, vector<4x96xbf16>
    tpu.vector_store %arg6[%c80, %c0_62], %42 {strides = array<i32>} : memref<112x512xbf16, #tpu.memory_space<vmem>>, vector<4x96xbf16>,
    %c4_63 = arith.constant 4 : index
    %c32_64 = arith.constant 32 : index
    %44 = vector.load %arg0[%c4_63, %c32_64] : memref<16x128xbf16, #tpu.memory_space<vmem>>, vector<4x96xbf16>
    %c84 = arith.constant 84 : index
    %c0_65 = arith.constant 0 : index
    %45 = vector.load %arg6[%c84, %c0_65] : memref<112x512xbf16, #tpu.memory_space<vmem>>, vector<4x96xbf16>
    tpu.vector_store %arg6[%c84, %c0_65], %44 {strides = array<i32>} : memref<112x512xbf16, #tpu.memory_space<vmem>>, vector<4x96xbf16>,
    %c0_66 = arith.constant 0 : index
    %c34 = arith.constant 34 : index
    %46 = vector.load %arg0[%c0_66, %c34] : memref<16x128xbf16, #tpu.memory_space<vmem>>, vector<4x94xbf16>
    %c88 = arith.constant 88 : index
    %c0_67 = arith.constant 0 : index
    %47 = vector.load %arg6[%c88, %c0_67] : memref<112x512xbf16, #tpu.memory_space<vmem>>, vector<4x94xbf16>
    tpu.vector_store %arg6[%c88, %c0_67], %46 {strides = array<i32>} : memref<112x512xbf16, #tpu.memory_space<vmem>>, vector<4x94xbf16>,
    %c4_68 = arith.constant 4 : index
    %c34_69 = arith.constant 34 : index
    %48 = vector.load %arg0[%c4_68, %c34_69] : memref<16x128xbf16, #tpu.memory_space<vmem>>, vector<4x94xbf16>
    %c92 = arith.constant 92 : index
    %c0_70 = arith.constant 0 : index
    %49 = vector.load %arg6[%c92, %c0_70] : memref<112x512xbf16, #tpu.memory_space<vmem>>, vector<4x94xbf16>
    tpu.vector_store %arg6[%c92, %c0_70], %48 {strides = array<i32>} : memref<112x512xbf16, #tpu.memory_space<vmem>>, vector<4x94xbf16>,
    %c0_71 = arith.constant 0 : index
    %c36_72 = arith.constant 36 : index
    %50 = vector.load %arg0[%c0_71, %c36_72] : memref<16x128xbf16, #tpu.memory_space<vmem>>, vector<4x92xbf16>
    %c96 = arith.constant 96 : index
    %c0_73 = arith.constant 0 : index
    %51 = vector.load %arg6[%c96, %c0_73] : memref<112x512xbf16, #tpu.memory_space<vmem>>, vector<4x92xbf16>
    tpu.vector_store %arg6[%c96, %c0_73], %50 {strides = array<i32>} : memref<112x512xbf16, #tpu.memory_space<vmem>>, vector<4x92xbf16>,
    %c0_74 = arith.constant 0 : index
    %c128 = arith.constant 128 : index
    %52 = vector.load %arg6[%c0_74, %c128] : memref<112x512xbf16, #tpu.memory_space<vmem>>, vector<4x128xbf16>
    tpu.vector_store %arg6[%c0_74, %c128], %4 {strides = array<i32>} : memref<112x512xbf16, #tpu.memory_space<vmem>>, vector<4x128xbf16>,
    %c4_75 = arith.constant 4 : index
    %c128_76 = arith.constant 128 : index
    %53 = vector.load %arg6[%c4_75, %c128_76] : memref<112x512xbf16, #tpu.memory_space<vmem>>, vector<4x126xbf16>
    tpu.vector_store %arg6[%c4_75, %c128_76], %6 {strides = array<i32>} : memref<112x512xbf16, #tpu.memory_space<vmem>>, vector<4x126xbf16>,
    %c8_77 = arith.constant 8 : index
    %c128_78 = arith.constant 128 : index
    %54 = vector.load %arg6[%c8_77, %c128_78] : memref<112x512xbf16, #tpu.memory_space<vmem>>, vector<4x126xbf16>
    tpu.vector_store %arg6[%c8_77, %c128_78], %8 {strides = array<i32>} : memref<112x512xbf16, #tpu.memory_space<vmem>>, vector<4x126xbf16>,
    %c12_79 = arith.constant 12 : index
    %c128_80 = arith.constant 128 : index
    %55 = vector.load %arg6[%c12_79, %c128_80] : memref<112x512xbf16, #tpu.memory_space<vmem>>, vector<4x124xbf16>
    tpu.vector_store %arg6[%c12_79, %c128_80], %10 {strides = array<i32>} : memref<112x512xbf16, #tpu.memory_space<vmem>>, vector<4x124xbf16>,
    %c4_81 = arith.constant 4 : index
    %c4_82 = arith.constant 4 : index
    %56 = vector.load %arg0[%c4_81, %c4_82] : memref<16x128xbf16, #tpu.memory_space<vmem>>, vector<4x124xbf16>
    %c16_83 = arith.constant 16 : index
    %c128_84 = arith.constant 128 : index
    %57 = vector.load %arg6[%c16_83, %c128_84] : memref<112x512xbf16, #tpu.memory_space<vmem>>, vector<4x124xbf16>
    tpu.vector_store %arg6[%c16_83, %c128_84], %56 {strides = array<i32>} : memref<112x512xbf16, #tpu.memory_space<vmem>>, vector<4x124xbf16>,
    %c20_85 = arith.constant 20 : index
    %c128_86 = arith.constant 128 : index
    %58 = vector.load %arg6[%c20_85, %c128_86] : memref<112x512xbf16, #tpu.memory_space<vmem>>, vector<4x128xbf16>
    tpu.vector_store %arg6[%c20_85, %c128_86], %14 {strides = array<i32>} : memref<112x512xbf16, #tpu.memory_space<vmem>>, vector<4x128xbf16>,
    %c24_87 = arith.constant 24 : index
    %c128_88 = arith.constant 128 : index
    %59 = vector.load %arg6[%c24_87, %c128_88] : memref<112x512xbf16, #tpu.memory_space<vmem>>, vector<4x126xbf16>
    tpu.vector_store %arg6[%c24_87, %c128_88], %16 {strides = array<i32>} : memref<112x512xbf16, #tpu.memory_space<vmem>>, vector<4x126xbf16>,
    %c28_89 = arith.constant 28 : index
    %c128_90 = arith.constant 128 : index
    %60 = vector.load %arg6[%c28_89, %c128_90] : memref<112x512xbf16, #tpu.memory_space<vmem>>, vector<4x126xbf16>
    tpu.vector_store %arg6[%c28_89, %c128_90], %18 {strides = array<i32>} : memref<112x512xbf16, #tpu.memory_space<vmem>>, vector<4x126xbf16>,
    %c32_91 = arith.constant 32 : index
    %c128_92 = arith.constant 128 : index
    %61 = vector.load %arg6[%c32_91, %c128_92] : memref<112x512xbf16, #tpu.memory_space<vmem>>, vector<4x124xbf16>
    tpu.vector_store %arg6[%c32_91, %c128_92], %20 {strides = array<i32>} : memref<112x512xbf16, #tpu.memory_space<vmem>>, vector<4x124xbf16>,
    %c12_93 = arith.constant 12 : index
    %c4_94 = arith.constant 4 : index
    %62 = vector.load %arg0[%c12_93, %c4_94] : memref<16x128xbf16, #tpu.memory_space<vmem>>, vector<4x124xbf16>
    %c36_95 = arith.constant 36 : index
    %c128_96 = arith.constant 128 : index
    %63 = vector.load %arg6[%c36_95, %c128_96] : memref<112x512xbf16, #tpu.memory_space<vmem>>, vector<4x124xbf16>
    tpu.vector_store %arg6[%c36_95, %c128_96], %62 {strides = array<i32>} : memref<112x512xbf16, #tpu.memory_space<vmem>>, vector<4x124xbf16>,
    %c40_97 = arith.constant 40 : index
    %c128_98 = arith.constant 128 : index
    %64 = vector.load %arg6[%c40_97, %c128_98] : memref<112x512xbf16, #tpu.memory_space<vmem>>, vector<4x112xbf16>
    tpu.vector_store %arg6[%c40_97, %c128_98], %24 {strides = array<i32>} : memref<112x512xbf16, #tpu.memory_space<vmem>>, vector<4x112xbf16>,
    %c44_99 = arith.constant 44 : index
    %c128_100 = arith.constant 128 : index
    %65 = vector.load %arg6[%c44_99, %c128_100] : memref<112x512xbf16, #tpu.memory_space<vmem>>, vector<4x110xbf16>
    tpu.vector_store %arg6[%c44_99, %c128_100], %26 {strides = array<i32>} : memref<112x512xbf16, #tpu.memory_space<vmem>>, vector<4x110xbf16>,
    %c48_101 = arith.constant 48 : index
    %c128_102 = arith.constant 128 : index
    %66 = vector.load %arg6[%c48_101, %c128_102] : memref<112x512xbf16, #tpu.memory_space<vmem>>, vector<4x110xbf16>
    tpu.vector_store %arg6[%c48_101, %c128_102], %28 {strides = array<i32>} : memref<112x512xbf16, #tpu.memory_space<vmem>>, vector<4x110xbf16>,
    %c52_103 = arith.constant 52 : index
    %c128_104 = arith.constant 128 : index
    %67 = vector.load %arg6[%c52_103, %c128_104] : memref<112x512xbf16, #tpu.memory_space<vmem>>, vector<4x108xbf16>
    tpu.vector_store %arg6[%c52_103, %c128_104], %30 {strides = array<i32>} : memref<112x512xbf16, #tpu.memory_space<vmem>>, vector<4x108xbf16>,
    %c4_105 = arith.constant 4 : index
    %c20_106 = arith.constant 20 : index
    %68 = vector.load %arg0[%c4_105, %c20_106] : memref<16x128xbf16, #tpu.memory_space<vmem>>, vector<4x108xbf16>
    %c56_107 = arith.constant 56 : index
    %c128_108 = arith.constant 128 : index
    %69 = vector.load %arg6[%c56_107, %c128_108] : memref<112x512xbf16, #tpu.memory_space<vmem>>, vector<4x108xbf16>
    tpu.vector_store %arg6[%c56_107, %c128_108], %68 {strides = array<i32>} : memref<112x512xbf16, #tpu.memory_space<vmem>>, vector<4x108xbf16>,
    %c60_109 = arith.constant 60 : index
    %c128_110 = arith.constant 128 : index
    %70 = vector.load %arg6[%c60_109, %c128_110] : memref<112x512xbf16, #tpu.memory_space<vmem>>, vector<4x112xbf16>
    tpu.vector_store %arg6[%c60_109, %c128_110], %34 {strides = array<i32>} : memref<112x512xbf16, #tpu.memory_space<vmem>>, vector<4x112xbf16>,
    %c64_111 = arith.constant 64 : index
    %c128_112 = arith.constant 128 : index
    %71 = vector.load %arg6[%c64_111, %c128_112] : memref<112x512xbf16, #tpu.memory_space<vmem>>, vector<4x110xbf16>
    tpu.vector_store %arg6[%c64_111, %c128_112], %36 {strides = array<i32>} : memref<112x512xbf16, #tpu.memory_space<vmem>>, vector<4x110xbf16>,
    %c68_113 = arith.constant 68 : index
    %c128_114 = arith.constant 128 : index
    %72 = vector.load %arg6[%c68_113, %c128_114] : memref<112x512xbf16, #tpu.memory_space<vmem>>, vector<4x110xbf16>
    tpu.vector_store %arg6[%c68_113, %c128_114], %38 {strides = array<i32>} : memref<112x512xbf16, #tpu.memory_space<vmem>>, vector<4x110xbf16>,
    %c72_115 = arith.constant 72 : index
    %c128_116 = arith.constant 128 : index
    %73 = vector.load %arg6[%c72_115, %c128_116] : memref<112x512xbf16, #tpu.memory_space<vmem>>, vector<4x108xbf16>
    tpu.vector_store %arg6[%c72_115, %c128_116], %40 {strides = array<i32>} : memref<112x512xbf16, #tpu.memory_space<vmem>>, vector<4x108xbf16>,
    %c12_117 = arith.constant 12 : index
    %c20_118 = arith.constant 20 : index
    %74 = vector.load %arg0[%c12_117, %c20_118] : memref<16x128xbf16, #tpu.memory_space<vmem>>, vector<4x108xbf16>
    %c76_119 = arith.constant 76 : index
    %c128_120 = arith.constant 128 : index
    %75 = vector.load %arg6[%c76_119, %c128_120] : memref<112x512xbf16, #tpu.memory_space<vmem>>, vector<4x108xbf16>
    tpu.vector_store %arg6[%c76_119, %c128_120], %74 {strides = array<i32>} : memref<112x512xbf16, #tpu.memory_space<vmem>>, vector<4x108xbf16>,
    %c80_121 = arith.constant 80 : index
    %c128_122 = arith.constant 128 : index
    %76 = vector.load %arg6[%c80_121, %c128_122] : memref<112x512xbf16, #tpu.memory_space<vmem>>, vector<4x96xbf16>
    tpu.vector_store %arg6[%c80_121, %c128_122], %44 {strides = array<i32>} : memref<112x512xbf16, #tpu.memory_space<vmem>>, vector<4x96xbf16>,
    %c84_123 = arith.constant 84 : index
    %c128_124 = arith.constant 128 : index
    %77 = vector.load %arg6[%c84_123, %c128_124] : memref<112x512xbf16, #tpu.memory_space<vmem>>, vector<4x94xbf16>
    tpu.vector_store %arg6[%c84_123, %c128_124], %46 {strides = array<i32>} : memref<112x512xbf16, #tpu.memory_space<vmem>>, vector<4x94xbf16>,
    %c88_125 = arith.constant 88 : index
    %c128_126 = arith.constant 128 : index
    %78 = vector.load %arg6[%c88_125, %c128_126] : memref<112x512xbf16, #tpu.memory_space<vmem>>, vector<4x94xbf16>
    tpu.vector_store %arg6[%c88_125, %c128_126], %48 {strides = array<i32>} : memref<112x512xbf16, #tpu.memory_space<vmem>>, vector<4x94xbf16>,
    %c92_127 = arith.constant 92 : index
    %c128_128 = arith.constant 128 : index
    %79 = vector.load %arg6[%c92_127, %c128_128] : memref<112x512xbf16, #tpu.memory_space<vmem>>, vector<4x92xbf16>
    tpu.vector_store %arg6[%c92_127, %c128_128], %50 {strides = array<i32>} : memref<112x512xbf16, #tpu.memory_space<vmem>>, vector<4x92xbf16>,
    %c4_129 = arith.constant 4 : index
    %c36_130 = arith.constant 36 : index
    %80 = vector.load %arg0[%c4_129, %c36_130] : memref<16x128xbf16, #tpu.memory_space<vmem>>, vector<4x92xbf16>
    %c96_131 = arith.constant 96 : index
    %c128_132 = arith.constant 128 : index
    %81 = vector.load %arg6[%c96_131, %c128_132] : memref<112x512xbf16, #tpu.memory_space<vmem>>, vector<4x92xbf16>
    tpu.vector_store %arg6[%c96_131, %c128_132], %80 {strides = array<i32>} : memref<112x512xbf16, #tpu.memory_space<vmem>>, vector<4x92xbf16>,
    %c0_133 = arith.constant 0 : index
    %c256 = arith.constant 256 : index
    %82 = vector.load %arg6[%c0_133, %c256] : memref<112x512xbf16, #tpu.memory_space<vmem>>, vector<4x128xbf16>
    tpu.vector_store %arg6[%c0_133, %c256], %12 {strides = array<i32>} : memref<112x512xbf16, #tpu.memory_space<vmem>>, vector<4x128xbf16>,
    %c4_134 = arith.constant 4 : index
    %c256_135 = arith.constant 256 : index
    %83 = vector.load %arg6[%c4_134, %c256_135] : memref<112x512xbf16, #tpu.memory_space<vmem>>, vector<4x128xbf16>
    tpu.vector_store %arg6[%c4_134, %c256_135], %14 {strides = array<i32>} : memref<112x512xbf16, #tpu.memory_space<vmem>>, vector<4x128xbf16>,
    %c8_136 = arith.constant 8 : index
    %c256_137 = arith.constant 256 : index
    %84 = vector.load %arg6[%c8_136, %c256_137] : memref<112x512xbf16, #tpu.memory_space<vmem>>, vector<4x126xbf16>
    tpu.vector_store %arg6[%c8_136, %c256_137], %16 {strides = array<i32>} : memref<112x512xbf16, #tpu.memory_space<vmem>>, vector<4x126xbf16>,
    %c12_138 = arith.constant 12 : index
    %c256_139 = arith.constant 256 : index
    %85 = vector.load %arg6[%c12_138, %c256_139] : memref<112x512xbf16, #tpu.memory_space<vmem>>, vector<4x126xbf16>
    tpu.vector_store %arg6[%c12_138, %c256_139], %18 {strides = array<i32>} : memref<112x512xbf16, #tpu.memory_space<vmem>>, vector<4x126xbf16>,
    %c16_140 = arith.constant 16 : index
    %c256_141 = arith.constant 256 : index
    %86 = vector.load %arg6[%c16_140, %c256_141] : memref<112x512xbf16, #tpu.memory_space<vmem>>, vector<4x124xbf16>
    tpu.vector_store %arg6[%c16_140, %c256_141], %20 {strides = array<i32>} : memref<112x512xbf16, #tpu.memory_space<vmem>>, vector<4x124xbf16>,
    %c20_142 = arith.constant 20 : index
    %c256_143 = arith.constant 256 : index
    %87 = vector.load %arg6[%c20_142, %c256_143] : memref<112x512xbf16, #tpu.memory_space<vmem>>, vector<4x112xbf16>
    tpu.vector_store %arg6[%c20_142, %c256_143], %22 {strides = array<i32>} : memref<112x512xbf16, #tpu.memory_space<vmem>>, vector<4x112xbf16>,
    %c24_144 = arith.constant 24 : index
    %c256_145 = arith.constant 256 : index
    %88 = vector.load %arg6[%c24_144, %c256_145] : memref<112x512xbf16, #tpu.memory_space<vmem>>, vector<4x112xbf16>
    tpu.vector_store %arg6[%c24_144, %c256_145], %24 {strides = array<i32>} : memref<112x512xbf16, #tpu.memory_space<vmem>>, vector<4x112xbf16>,
    %c28_146 = arith.constant 28 : index
    %c256_147 = arith.constant 256 : index
    %89 = vector.load %arg6[%c28_146, %c256_147] : memref<112x512xbf16, #tpu.memory_space<vmem>>, vector<4x110xbf16>
    tpu.vector_store %arg6[%c28_146, %c256_147], %26 {strides = array<i32>} : memref<112x512xbf16, #tpu.memory_space<vmem>>, vector<4x110xbf16>,
    %c32_148 = arith.constant 32 : index
    %c256_149 = arith.constant 256 : index
    %90 = vector.load %arg6[%c32_148, %c256_149] : memref<112x512xbf16, #tpu.memory_space<vmem>>, vector<4x110xbf16>
    tpu.vector_store %arg6[%c32_148, %c256_149], %28 {strides = array<i32>} : memref<112x512xbf16, #tpu.memory_space<vmem>>, vector<4x110xbf16>,
    %c36_150 = arith.constant 36 : index
    %c256_151 = arith.constant 256 : index
    %91 = vector.load %arg6[%c36_150, %c256_151] : memref<112x512xbf16, #tpu.memory_space<vmem>>, vector<4x108xbf16>
    tpu.vector_store %arg6[%c36_150, %c256_151], %30 {strides = array<i32>} : memref<112x512xbf16, #tpu.memory_space<vmem>>, vector<4x108xbf16>,
    %c40_152 = arith.constant 40 : index
    %c256_153 = arith.constant 256 : index
    %92 = vector.load %arg6[%c40_152, %c256_153] : memref<112x512xbf16, #tpu.memory_space<vmem>>, vector<4x112xbf16>
    tpu.vector_store %arg6[%c40_152, %c256_153], %32 {strides = array<i32>} : memref<112x512xbf16, #tpu.memory_space<vmem>>, vector<4x112xbf16>,
    %c44_154 = arith.constant 44 : index
    %c256_155 = arith.constant 256 : index
    %93 = vector.load %arg6[%c44_154, %c256_155] : memref<112x512xbf16, #tpu.memory_space<vmem>>, vector<4x112xbf16>
    tpu.vector_store %arg6[%c44_154, %c256_155], %34 {strides = array<i32>} : memref<112x512xbf16, #tpu.memory_space<vmem>>, vector<4x112xbf16>,
    %c48_156 = arith.constant 48 : index
    %c256_157 = arith.constant 256 : index
    %94 = vector.load %arg6[%c48_156, %c256_157] : memref<112x512xbf16, #tpu.memory_space<vmem>>, vector<4x110xbf16>
    tpu.vector_store %arg6[%c48_156, %c256_157], %36 {strides = array<i32>} : memref<112x512xbf16, #tpu.memory_space<vmem>>, vector<4x110xbf16>,
    %c52_158 = arith.constant 52 : index
    %c256_159 = arith.constant 256 : index
    %95 = vector.load %arg6[%c52_158, %c256_159] : memref<112x512xbf16, #tpu.memory_space<vmem>>, vector<4x110xbf16>
    tpu.vector_store %arg6[%c52_158, %c256_159], %38 {strides = array<i32>} : memref<112x512xbf16, #tpu.memory_space<vmem>>, vector<4x110xbf16>,
    %c56_160 = arith.constant 56 : index
    %c256_161 = arith.constant 256 : index
    %96 = vector.load %arg6[%c56_160, %c256_161] : memref<112x512xbf16, #tpu.memory_space<vmem>>, vector<4x108xbf16>
    tpu.vector_store %arg6[%c56_160, %c256_161], %40 {strides = array<i32>} : memref<112x512xbf16, #tpu.memory_space<vmem>>, vector<4x108xbf16>,
    %c60_162 = arith.constant 60 : index
    %c256_163 = arith.constant 256 : index
    %97 = vector.load %arg6[%c60_162, %c256_163] : memref<112x512xbf16, #tpu.memory_space<vmem>>, vector<4x96xbf16>
    tpu.vector_store %arg6[%c60_162, %c256_163], %42 {strides = array<i32>} : memref<112x512xbf16, #tpu.memory_space<vmem>>, vector<4x96xbf16>,
    %c64_164 = arith.constant 64 : index
    %c256_165 = arith.constant 256 : index
    %98 = vector.load %arg6[%c64_164, %c256_165] : memref<112x512xbf16, #tpu.memory_space<vmem>>, vector<4x96xbf16>
    tpu.vector_store %arg6[%c64_164, %c256_165], %44 {strides = array<i32>} : memref<112x512xbf16, #tpu.memory_space<vmem>>, vector<4x96xbf16>,
    %c68_166 = arith.constant 68 : index
    %c256_167 = arith.constant 256 : index
    %99 = vector.load %arg6[%c68_166, %c256_167] : memref<112x512xbf16, #tpu.memory_space<vmem>>, vector<4x94xbf16>
    tpu.vector_store %arg6[%c68_166, %c256_167], %46 {strides = array<i32>} : memref<112x512xbf16, #tpu.memory_space<vmem>>, vector<4x94xbf16>,
    %c72_168 = arith.constant 72 : index
    %c256_169 = arith.constant 256 : index
    %100 = vector.load %arg6[%c72_168, %c256_169] : memref<112x512xbf16, #tpu.memory_space<vmem>>, vector<4x94xbf16>
    tpu.vector_store %arg6[%c72_168, %c256_169], %48 {strides = array<i32>} : memref<112x512xbf16, #tpu.memory_space<vmem>>, vector<4x94xbf16>,
    %c76_170 = arith.constant 76 : index
    %c256_171 = arith.constant 256 : index
    %101 = vector.load %arg6[%c76_170, %c256_171] : memref<112x512xbf16, #tpu.memory_space<vmem>>, vector<4x92xbf16>
    tpu.vector_store %arg6[%c76_170, %c256_171], %50 {strides = array<i32>} : memref<112x512xbf16, #tpu.memory_space<vmem>>, vector<4x92xbf16>,
    %c8_172 = arith.constant 8 : index
    %c32_173 = arith.constant 32 : index
    %102 = vector.load %arg0[%c8_172, %c32_173] : memref<16x128xbf16, #tpu.memory_space<vmem>>, vector<4x96xbf16>
    %c80_174 = arith.constant 80 : index
    %c256_175 = arith.constant 256 : index
    %103 = vector.load %arg6[%c80_174, %c256_175] : memref<112x512xbf16, #tpu.memory_space<vmem>>, vector<4x96xbf16>
    tpu.vector_store %arg6[%c80_174, %c256_175], %102 {strides = array<i32>} : memref<112x512xbf16, #tpu.memory_space<vmem>>, vector<4x96xbf16>,
    %c12_176 = arith.constant 12 : index
    %c32_177 = arith.constant 32 : index
    %104 = vector.load %arg0[%c12_176, %c32_177] : memref<16x128xbf16, #tpu.memory_space<vmem>>, vector<4x96xbf16>
    %c84_178 = arith.constant 84 : index
    %c256_179 = arith.constant 256 : index
    %105 = vector.load %arg6[%c84_178, %c256_179] : memref<112x512xbf16, #tpu.memory_space<vmem>>, vector<4x96xbf16>
    tpu.vector_store %arg6[%c84_178, %c256_179], %104 {strides = array<i32>} : memref<112x512xbf16, #tpu.memory_space<vmem>>, vector<4x96xbf16>,
    %c8_180 = arith.constant 8 : index
    %c34_181 = arith.constant 34 : index
    %106 = vector.load %arg0[%c8_180, %c34_181] : memref<16x128xbf16, #tpu.memory_space<vmem>>, vector<4x94xbf16>
    %c88_182 = arith.constant 88 : index
    %c256_183 = arith.constant 256 : index
    %107 = vector.load %arg6[%c88_182, %c256_183] : memref<112x512xbf16, #tpu.memory_space<vmem>>, vector<4x94xbf16>
    tpu.vector_store %arg6[%c88_182, %c256_183], %106 {strides = array<i32>} : memref<112x512xbf16, #tpu.memory_space<vmem>>, vector<4x94xbf16>,
    %c12_184 = arith.constant 12 : index
    %c34_185 = arith.constant 34 : index
    %108 = vector.load %arg0[%c12_184, %c34_185] : memref<16x128xbf16, #tpu.memory_space<vmem>>, vector<4x94xbf16>
    %c92_186 = arith.constant 92 : index
    %c256_187 = arith.constant 256 : index
    %109 = vector.load %arg6[%c92_186, %c256_187] : memref<112x512xbf16, #tpu.memory_space<vmem>>, vector<4x94xbf16>
    tpu.vector_store %arg6[%c92_186, %c256_187], %108 {strides = array<i32>} : memref<112x512xbf16, #tpu.memory_space<vmem>>, vector<4x94xbf16>,
    %c8_188 = arith.constant 8 : index
    %c36_189 = arith.constant 36 : index
    %110 = vector.load %arg0[%c8_188, %c36_189] : memref<16x128xbf16, #tpu.memory_space<vmem>>, vector<4x92xbf16>
    %c96_190 = arith.constant 96 : index
    %c256_191 = arith.constant 256 : index
    %111 = vector.load %arg6[%c96_190, %c256_191] : memref<112x512xbf16, #tpu.memory_space<vmem>>, vector<4x92xbf16>
    tpu.vector_store %arg6[%c96_190, %c256_191], %110 {strides = array<i32>} : memref<112x512xbf16, #tpu.memory_space<vmem>>, vector<4x92xbf16>,
    %c0_192 = arith.constant 0 : index
    %c384 = arith.constant 384 : index
    %112 = vector.load %arg6[%c0_192, %c384] : memref<112x512xbf16, #tpu.memory_space<vmem>>, vector<4x128xbf16>
    tpu.vector_store %arg6[%c0_192, %c384], %14 {strides = array<i32>} : memref<112x512xbf16, #tpu.memory_space<vmem>>, vector<4x128xbf16>,
    %c4_193 = arith.constant 4 : index
    %c384_194 = arith.constant 384 : index
    %113 = vector.load %arg6[%c4_193, %c384_194] : memref<112x512xbf16, #tpu.memory_space<vmem>>, vector<4x126xbf16>
    tpu.vector_store %arg6[%c4_193, %c384_194], %16 {strides = array<i32>} : memref<112x512xbf16, #tpu.memory_space<vmem>>, vector<4x126xbf16>,
    %c8_195 = arith.constant 8 : index
    %c384_196 = arith.constant 384 : index
    %114 = vector.load %arg6[%c8_195, %c384_196] : memref<112x512xbf16, #tpu.memory_space<vmem>>, vector<4x126xbf16>
    tpu.vector_store %arg6[%c8_195, %c384_196], %18 {strides = array<i32>} : memref<112x512xbf16, #tpu.memory_space<vmem>>, vector<4x126xbf16>,
    %c12_197 = arith.constant 12 : index
    %c384_198 = arith.constant 384 : index
    %115 = vector.load %arg6[%c12_197, %c384_198] : memref<112x512xbf16, #tpu.memory_space<vmem>>, vector<4x124xbf16>
    tpu.vector_store %arg6[%c12_197, %c384_198], %20 {strides = array<i32>} : memref<112x512xbf16, #tpu.memory_space<vmem>>, vector<4x124xbf16>,
    %c16_199 = arith.constant 16 : index
    %c384_200 = arith.constant 384 : index
    %116 = vector.load %arg6[%c16_199, %c384_200] : memref<112x512xbf16, #tpu.memory_space<vmem>>, vector<4x124xbf16>
    tpu.vector_store %arg6[%c16_199, %c384_200], %62 {strides = array<i32>} : memref<112x512xbf16, #tpu.memory_space<vmem>>, vector<4x124xbf16>,
    %c20_201 = arith.constant 20 : index
    %c384_202 = arith.constant 384 : index
    %117 = vector.load %arg6[%c20_201, %c384_202] : memref<112x512xbf16, #tpu.memory_space<vmem>>, vector<4x112xbf16>
    tpu.vector_store %arg6[%c20_201, %c384_202], %24 {strides = array<i32>} : memref<112x512xbf16, #tpu.memory_space<vmem>>, vector<4x112xbf16>,
    %c24_203 = arith.constant 24 : index
    %c384_204 = arith.constant 384 : index
    %118 = vector.load %arg6[%c24_203, %c384_204] : memref<112x512xbf16, #tpu.memory_space<vmem>>, vector<4x110xbf16>
    tpu.vector_store %arg6[%c24_203, %c384_204], %26 {strides = array<i32>} : memref<112x512xbf16, #tpu.memory_space<vmem>>, vector<4x110xbf16>,
    %c28_205 = arith.constant 28 : index
    %c384_206 = arith.constant 384 : index
    %119 = vector.load %arg6[%c28_205, %c384_206] : memref<112x512xbf16, #tpu.memory_space<vmem>>, vector<4x110xbf16>
    tpu.vector_store %arg6[%c28_205, %c384_206], %28 {strides = array<i32>} : memref<112x512xbf16, #tpu.memory_space<vmem>>, vector<4x110xbf16>,
    %c32_207 = arith.constant 32 : index
    %c384_208 = arith.constant 384 : index
    %120 = vector.load %arg6[%c32_207, %c384_208] : memref<112x512xbf16, #tpu.memory_space<vmem>>, vector<4x108xbf16>
    tpu.vector_store %arg6[%c32_207, %c384_208], %30 {strides = array<i32>} : memref<112x512xbf16, #tpu.memory_space<vmem>>, vector<4x108xbf16>,
    %c36_209 = arith.constant 36 : index
    %c384_210 = arith.constant 384 : index
    %121 = vector.load %arg6[%c36_209, %c384_210] : memref<112x512xbf16, #tpu.memory_space<vmem>>, vector<4x108xbf16>
    tpu.vector_store %arg6[%c36_209, %c384_210], %68 {strides = array<i32>} : memref<112x512xbf16, #tpu.memory_space<vmem>>, vector<4x108xbf16>,
    %c40_211 = arith.constant 40 : index
    %c384_212 = arith.constant 384 : index
    %122 = vector.load %arg6[%c40_211, %c384_212] : memref<112x512xbf16, #tpu.memory_space<vmem>>, vector<4x112xbf16>
    tpu.vector_store %arg6[%c40_211, %c384_212], %34 {strides = array<i32>} : memref<112x512xbf16, #tpu.memory_space<vmem>>, vector<4x112xbf16>,
    %c44_213 = arith.constant 44 : index
    %c384_214 = arith.constant 384 : index
    %123 = vector.load %arg6[%c44_213, %c384_214] : memref<112x512xbf16, #tpu.memory_space<vmem>>, vector<4x110xbf16>
    tpu.vector_store %arg6[%c44_213, %c384_214], %36 {strides = array<i32>} : memref<112x512xbf16, #tpu.memory_space<vmem>>, vector<4x110xbf16>,
    %c48_215 = arith.constant 48 : index
    %c384_216 = arith.constant 384 : index
    %124 = vector.load %arg6[%c48_215, %c384_216] : memref<112x512xbf16, #tpu.memory_space<vmem>>, vector<4x110xbf16>
    tpu.vector_store %arg6[%c48_215, %c384_216], %38 {strides = array<i32>} : memref<112x512xbf16, #tpu.memory_space<vmem>>, vector<4x110xbf16>,
    %c52_217 = arith.constant 52 : index
    %c384_218 = arith.constant 384 : index
    %125 = vector.load %arg6[%c52_217, %c384_218] : memref<112x512xbf16, #tpu.memory_space<vmem>>, vector<4x108xbf16>
    tpu.vector_store %arg6[%c52_217, %c384_218], %40 {strides = array<i32>} : memref<112x512xbf16, #tpu.memory_space<vmem>>, vector<4x108xbf16>,
    %c56_219 = arith.constant 56 : index
    %c384_220 = arith.constant 384 : index
    %126 = vector.load %arg6[%c56_219, %c384_220] : memref<112x512xbf16, #tpu.memory_space<vmem>>, vector<4x108xbf16>
    tpu.vector_store %arg6[%c56_219, %c384_220], %74 {strides = array<i32>} : memref<112x512xbf16, #tpu.memory_space<vmem>>, vector<4x108xbf16>,
    %c60_221 = arith.constant 60 : index
    %c384_222 = arith.constant 384 : index
    %127 = vector.load %arg6[%c60_221, %c384_222] : memref<112x512xbf16, #tpu.memory_space<vmem>>, vector<4x96xbf16>
    tpu.vector_store %arg6[%c60_221, %c384_222], %44 {strides = array<i32>} : memref<112x512xbf16, #tpu.memory_space<vmem>>, vector<4x96xbf16>,
    %c64_223 = arith.constant 64 : index
    %c384_224 = arith.constant 384 : index
    %128 = vector.load %arg6[%c64_223, %c384_224] : memref<112x512xbf16, #tpu.memory_space<vmem>>, vector<4x94xbf16>
    tpu.vector_store %arg6[%c64_223, %c384_224], %46 {strides = array<i32>} : memref<112x512xbf16, #tpu.memory_space<vmem>>, vector<4x94xbf16>,
    %c68_225 = arith.constant 68 : index
    %c384_226 = arith.constant 384 : index
    %129 = vector.load %arg6[%c68_225, %c384_226] : memref<112x512xbf16, #tpu.memory_space<vmem>>, vector<4x94xbf16>
    tpu.vector_store %arg6[%c68_225, %c384_226], %48 {strides = array<i32>} : memref<112x512xbf16, #tpu.memory_space<vmem>>, vector<4x94xbf16>,
    %c72_227 = arith.constant 72 : index
    %c384_228 = arith.constant 384 : index
    %130 = vector.load %arg6[%c72_227, %c384_228] : memref<112x512xbf16, #tpu.memory_space<vmem>>, vector<4x92xbf16>
    tpu.vector_store %arg6[%c72_227, %c384_228], %50 {strides = array<i32>} : memref<112x512xbf16, #tpu.memory_space<vmem>>, vector<4x92xbf16>,
    %c76_229 = arith.constant 76 : index
    %c384_230 = arith.constant 384 : index
    %131 = vector.load %arg6[%c76_229, %c384_230] : memref<112x512xbf16, #tpu.memory_space<vmem>>, vector<4x92xbf16>
    tpu.vector_store %arg6[%c76_229, %c384_230], %80 {strides = array<i32>} : memref<112x512xbf16, #tpu.memory_space<vmem>>, vector<4x92xbf16>,
    %c80_231 = arith.constant 80 : index
    %c384_232 = arith.constant 384 : index
    %132 = vector.load %arg6[%c80_231, %c384_232] : memref<112x512xbf16, #tpu.memory_space<vmem>>, vector<4x96xbf16>
    tpu.vector_store %arg6[%c80_231, %c384_232], %104 {strides = array<i32>} : memref<112x512xbf16, #tpu.memory_space<vmem>>, vector<4x96xbf16>,
    %c84_233 = arith.constant 84 : index
    %c384_234 = arith.constant 384 : index
    %133 = vector.load %arg6[%c84_233, %c384_234] : memref<112x512xbf16, #tpu.memory_space<vmem>>, vector<4x94xbf16>
    tpu.vector_store %arg6[%c84_233, %c384_234], %106 {strides = array<i32>} : memref<112x512xbf16, #tpu.memory_space<vmem>>, vector<4x94xbf16>,
    %c88_235 = arith.constant 88 : index
    %c384_236 = arith.constant 384 : index
    %134 = vector.load %arg6[%c88_235, %c384_236] : memref<112x512xbf16, #tpu.memory_space<vmem>>, vector<4x94xbf16>
    tpu.vector_store %arg6[%c88_235, %c384_236], %108 {strides = array<i32>} : memref<112x512xbf16, #tpu.memory_space<vmem>>, vector<4x94xbf16>,
    %c92_237 = arith.constant 92 : index
    %c384_238 = arith.constant 384 : index
    %135 = vector.load %arg6[%c92_237, %c384_238] : memref<112x512xbf16, #tpu.memory_space<vmem>>, vector<4x92xbf16>
    tpu.vector_store %arg6[%c92_237, %c384_238], %110 {strides = array<i32>} : memref<112x512xbf16, #tpu.memory_space<vmem>>, vector<4x92xbf16>,
    %c12_239 = arith.constant 12 : index
    %c36_240 = arith.constant 36 : index
    %136 = vector.load %arg0[%c12_239, %c36_240] : memref<16x128xbf16, #tpu.memory_space<vmem>>, vector<4x92xbf16>
    %c96_241 = arith.constant 96 : index
    %c384_242 = arith.constant 384 : index
    %137 = vector.load %arg6[%c96_241, %c384_242] : memref<112x512xbf16, #tpu.memory_space<vmem>>, vector<4x92xbf16>
    tpu.vector_store %arg6[%c96_241, %c384_242], %136 {strides = array<i32>} : memref<112x512xbf16, #tpu.memory_space<vmem>>, vector<4x92xbf16>,
    %c0_243 = arith.constant 0 : index
    %c0_244 = arith.constant 0 : index
    %138 = vector.load %arg1[%c0_243, %c0_244] : memref<8x112xbf16, #tpu.memory_space<vmem>>, vector<8x112xbf16>
    %c0_245 = arith.constant 0 : index
    %c0_246 = arith.constant 0 : index
    %139 = vector.load %arg6[%c0_245, %c0_246] : memref<112x512xbf16, #tpu.memory_space<vmem>>, vector<112x512xbf16>
    %cst_247 = arith.constant dense<0.000000e+00> : vector<8x512xf32>
    %140 = tpu.matmul %138, %139, %cst_247 {dimension_numbers = #tpu.dot_dimension_numbers<[1], [0], [0], [1], [0, 0, 1, 1], [], []>} : vector<8x112xbf16>, vector<112x512xbf16>, vector<8x512xf32> -> vector<8x512xf32>
    %c0_248 = arith.constant 0 : index
    %c0_249 = arith.constant 0 : index
    %141 = vector.load %arg4[%c0_248, %c0_249] : memref<1x512xf32, #tpu.memory_space<vmem>>, vector<1x512xf32>
    %142 = vector.broadcast %141 : vector<1x512xf32> to vector<8x512xf32>
    %143 = arith.mulf %140, %142 : vector<8x512xf32>
    %cst_250 = arith.constant dense<0.000000e+00> : vector<8xf32>
    %144 = vector.multi_reduction <add>, %143, %cst_250 [1] : vector<8x512xf32> to vector<8xf32>
    %145 = vector.shape_cast %144 : vector<8xf32> to vector<8x1xf32>
    %cst_251 = arith.constant 0.00347222225 : f32
    %146 = vector.broadcast %cst_251 : f32 to vector<8x1xf32>
    %147 = arith.mulf %145, %146 : vector<8x1xf32>
    %148 = arith.mulf %143, %143 : vector<8x512xf32>
    %cst_252 = arith.constant dense<0.000000e+00> : vector<8xf32>
    %149 = vector.multi_reduction <add>, %148, %cst_252 [1] : vector<8x512xf32> to vector<8xf32>
    %150 = vector.shape_cast %149 : vector<8xf32> to vector<8x1xf32>
    %cst_253 = arith.constant 0.00347222225 : f32
    %151 = vector.broadcast %cst_253 : f32 to vector<8x1xf32>
    %152 = arith.mulf %150, %151 : vector<8x1xf32>
    %153 = arith.mulf %147, %147 : vector<8x1xf32>
    %154 = arith.subf %152, %153 : vector<8x1xf32>
    %cst_254 = arith.constant 0.000000e+00 : f32
    %155 = vector.broadcast %cst_254 : f32 to vector<8x1xf32>
    %156 = arith.maximumf %154, %155 : vector<8x1xf32>
    %c0_255 = arith.constant 0 : index
    %c0_256 = arith.constant 0 : index
    %157 = vector.load %arg2[%c0_255, %c0_256] : memref<8x1xf32, #tpu.memory_space<vmem>>, vector<8x1xf32>
    %cst_257 = arith.constant 9.99999974E-6 : f32
    %158 = vector.broadcast %cst_257 : f32 to vector<8x1xf32>
    %159 = arith.addf %156, %158 : vector<8x1xf32>
    %160 = math.rsqrt %159 : vector<8x1xf32>
    %161 = arith.mulf %157, %160 : vector<8x1xf32>
    %c0_258 = arith.constant 0 : index
    %c0_259 = arith.constant 0 : index
    %162 = vector.load %arg3[%c0_258, %c0_259] : memref<8x1xf32, #tpu.memory_space<vmem>>, vector<8x1xf32>
    %163 = arith.mulf %161, %147 : vector<8x1xf32>
    %164 = arith.subf %162, %163 : vector<8x1xf32>
    %165 = vector.broadcast %161 : vector<8x1xf32> to vector<8x512xf32>
    %166 = arith.mulf %140, %165 : vector<8x512xf32>
    %167 = vector.broadcast %164 : vector<8x1xf32> to vector<8x512xf32>
    %168 = arith.addf %166, %167 : vector<8x512xf32>
    %cst_260 = arith.constant 0.000000e+00 : f32
    %169 = vector.broadcast %cst_260 : f32 to vector<8x512xf32>
    %170 = arith.maximumf %168, %169 : vector<8x512xf32>
    %171 = vector.extract_strided_slice %170 {offsets = [0, 0], sizes = [8, 128], strides = [1, 1]} : vector<8x512xf32> to vector<8x128xf32>
    %172 = vector.extract_strided_slice %170 {offsets = [0, 128], sizes = [8, 128], strides = [1, 1]} : vector<8x512xf32> to vector<8x128xf32>
    %173 = arith.maximumf %171, %172 : vector<8x128xf32>
    %174 = vector.extract_strided_slice %170 {offsets = [0, 256], sizes = [8, 128], strides = [1, 1]} : vector<8x512xf32> to vector<8x128xf32>
    %175 = arith.maximumf %173, %174 : vector<8x128xf32>
    %176 = vector.extract_strided_slice %170 {offsets = [0, 384], sizes = [8, 128], strides = [1, 1]} : vector<8x512xf32> to vector<8x128xf32>
    %177 = arith.maximumf %175, %176 : vector<8x128xf32>
    %c0_261 = arith.constant 0 : index
    %c0_262 = arith.constant 0 : index
    %178 = vector.load %arg5[%c0_261, %c0_262] : memref<8x128xf32, #tpu.memory_space<vmem>>, vector<8x128xf32>
    tpu.vector_store %arg5[%c0_261, %c0_262], %177 {strides = array<i32>} : memref<8x128xf32, #tpu.memory_space<vmem>>, vector<8x128xf32>,
    return
  }
}

module attributes {stable_mosaic.version = 11 : i64} {
  func.func @_conv_block_kernel(%arg0: memref<32x128xbf16, #tpu.memory_space<vmem>>, %arg1: memref<16x80xbf16, #tpu.memory_space<vmem>>, %arg2: memref<16x1xf32, #tpu.memory_space<vmem>>, %arg3: memref<16x1xf32, #tpu.memory_space<vmem>>, %arg4: memref<1x512xf32, #tpu.memory_space<vmem>>, %arg5: memref<16x128xf32, #tpu.memory_space<vmem>>, %arg6: memref<80x512xbf16, #tpu.memory_space<vmem>>) attributes {dimension_semantics = [], scalar_prefetch = 0 : i64, scratch_operands = 1 : i64, tpu.core_type = #tpu.core_type<tc>} {
    %cst = arith.constant 0.000000e+00 : bf16
    %0 = vector.broadcast %cst : bf16 to vector<80x512xbf16>
    %c0 = arith.constant 0 : index
    %c0_0 = arith.constant 0 : index
    %1 = vector.load %arg6[%c0, %c0_0] : memref<80x512xbf16, #tpu.memory_space<vmem>>, vector<80x512xbf16>
    tpu.vector_store %arg6[%c0, %c0_0], %0 {strides = array<i32>} : memref<80x512xbf16, #tpu.memory_space<vmem>>, vector<80x512xbf16>,
    %c0_1 = arith.constant 0 : index
    %c0_2 = arith.constant 0 : index
    %2 = vector.load %arg0[%c0_1, %c0_2] : memref<32x128xbf16, #tpu.memory_space<vmem>>, vector<8x128xbf16>
    %c0_3 = arith.constant 0 : index
    %c0_4 = arith.constant 0 : index
    %3 = vector.load %arg6[%c0_3, %c0_4] : memref<80x512xbf16, #tpu.memory_space<vmem>>, vector<8x128xbf16>
    tpu.vector_store %arg6[%c0_3, %c0_4], %2 {strides = array<i32>} : memref<80x512xbf16, #tpu.memory_space<vmem>>, vector<8x128xbf16>,
    %c8 = arith.constant 8 : index
    %c0_5 = arith.constant 0 : index
    %4 = vector.load %arg0[%c8, %c0_5] : memref<32x128xbf16, #tpu.memory_space<vmem>>, vector<8x128xbf16>
    %c8_6 = arith.constant 8 : index
    %c0_7 = arith.constant 0 : index
    %5 = vector.load %arg6[%c8_6, %c0_7] : memref<80x512xbf16, #tpu.memory_space<vmem>>, vector<8x128xbf16>
    tpu.vector_store %arg6[%c8_6, %c0_7], %4 {strides = array<i32>} : memref<80x512xbf16, #tpu.memory_space<vmem>>, vector<8x128xbf16>,
    %c0_8 = arith.constant 0 : index
    %c2 = arith.constant 2 : index
    %6 = vector.load %arg0[%c0_8, %c2] : memref<32x128xbf16, #tpu.memory_space<vmem>>, vector<8x126xbf16>
    %c16 = arith.constant 16 : index
    %c0_9 = arith.constant 0 : index
    %7 = vector.load %arg6[%c16, %c0_9] : memref<80x512xbf16, #tpu.memory_space<vmem>>, vector<8x126xbf16>
    tpu.vector_store %arg6[%c16, %c0_9], %6 {strides = array<i32>} : memref<80x512xbf16, #tpu.memory_space<vmem>>, vector<8x126xbf16>,
    %c16_10 = arith.constant 16 : index
    %c0_11 = arith.constant 0 : index
    %8 = vector.load %arg0[%c16_10, %c0_11] : memref<32x128xbf16, #tpu.memory_space<vmem>>, vector<8x128xbf16>
    %c24 = arith.constant 24 : index
    %c0_12 = arith.constant 0 : index
    %9 = vector.load %arg6[%c24, %c0_12] : memref<80x512xbf16, #tpu.memory_space<vmem>>, vector<8x128xbf16>
    tpu.vector_store %arg6[%c24, %c0_12], %8 {strides = array<i32>} : memref<80x512xbf16, #tpu.memory_space<vmem>>, vector<8x128xbf16>,
    %c24_13 = arith.constant 24 : index
    %c0_14 = arith.constant 0 : index
    %10 = vector.load %arg0[%c24_13, %c0_14] : memref<32x128xbf16, #tpu.memory_space<vmem>>, vector<8x128xbf16>
    %c32 = arith.constant 32 : index
    %c0_15 = arith.constant 0 : index
    %11 = vector.load %arg6[%c32, %c0_15] : memref<80x512xbf16, #tpu.memory_space<vmem>>, vector<8x128xbf16>
    tpu.vector_store %arg6[%c32, %c0_15], %10 {strides = array<i32>} : memref<80x512xbf16, #tpu.memory_space<vmem>>, vector<8x128xbf16>,
    %c16_16 = arith.constant 16 : index
    %c2_17 = arith.constant 2 : index
    %12 = vector.load %arg0[%c16_16, %c2_17] : memref<32x128xbf16, #tpu.memory_space<vmem>>, vector<8x126xbf16>
    %c40 = arith.constant 40 : index
    %c0_18 = arith.constant 0 : index
    %13 = vector.load %arg6[%c40, %c0_18] : memref<80x512xbf16, #tpu.memory_space<vmem>>, vector<8x126xbf16>
    tpu.vector_store %arg6[%c40, %c0_18], %12 {strides = array<i32>} : memref<80x512xbf16, #tpu.memory_space<vmem>>, vector<8x126xbf16>,
    %c0_19 = arith.constant 0 : index
    %c6 = arith.constant 6 : index
    %14 = vector.load %arg0[%c0_19, %c6] : memref<32x128xbf16, #tpu.memory_space<vmem>>, vector<8x122xbf16>
    %c48 = arith.constant 48 : index
    %c0_20 = arith.constant 0 : index
    %15 = vector.load %arg6[%c48, %c0_20] : memref<80x512xbf16, #tpu.memory_space<vmem>>, vector<8x122xbf16>
    tpu.vector_store %arg6[%c48, %c0_20], %14 {strides = array<i32>} : memref<80x512xbf16, #tpu.memory_space<vmem>>, vector<8x122xbf16>,
    %c8_21 = arith.constant 8 : index
    %c6_22 = arith.constant 6 : index
    %16 = vector.load %arg0[%c8_21, %c6_22] : memref<32x128xbf16, #tpu.memory_space<vmem>>, vector<8x122xbf16>
    %c56 = arith.constant 56 : index
    %c0_23 = arith.constant 0 : index
    %17 = vector.load %arg6[%c56, %c0_23] : memref<80x512xbf16, #tpu.memory_space<vmem>>, vector<8x122xbf16>
    tpu.vector_store %arg6[%c56, %c0_23], %16 {strides = array<i32>} : memref<80x512xbf16, #tpu.memory_space<vmem>>, vector<8x122xbf16>,
    %c0_24 = arith.constant 0 : index
    %c8_25 = arith.constant 8 : index
    %18 = vector.load %arg0[%c0_24, %c8_25] : memref<32x128xbf16, #tpu.memory_space<vmem>>, vector<8x120xbf16>
    %c64 = arith.constant 64 : index
    %c0_26 = arith.constant 0 : index
    %19 = vector.load %arg6[%c64, %c0_26] : memref<80x512xbf16, #tpu.memory_space<vmem>>, vector<8x120xbf16>
    tpu.vector_store %arg6[%c64, %c0_26], %18 {strides = array<i32>} : memref<80x512xbf16, #tpu.memory_space<vmem>>, vector<8x120xbf16>,
    %c0_27 = arith.constant 0 : index
    %c128 = arith.constant 128 : index
    %20 = vector.load %arg6[%c0_27, %c128] : memref<80x512xbf16, #tpu.memory_space<vmem>>, vector<8x128xbf16>
    tpu.vector_store %arg6[%c0_27, %c128], %4 {strides = array<i32>} : memref<80x512xbf16, #tpu.memory_space<vmem>>, vector<8x128xbf16>,
    %c8_28 = arith.constant 8 : index
    %c128_29 = arith.constant 128 : index
    %21 = vector.load %arg6[%c8_28, %c128_29] : memref<80x512xbf16, #tpu.memory_space<vmem>>, vector<8x126xbf16>
    tpu.vector_store %arg6[%c8_28, %c128_29], %6 {strides = array<i32>} : memref<80x512xbf16, #tpu.memory_space<vmem>>, vector<8x126xbf16>,
    %c8_30 = arith.constant 8 : index
    %c2_31 = arith.constant 2 : index
    %22 = vector.load %arg0[%c8_30, %c2_31] : memref<32x128xbf16, #tpu.memory_space<vmem>>, vector<8x126xbf16>
    %c16_32 = arith.constant 16 : index
    %c128_33 = arith.constant 128 : index
    %23 = vector.load %arg6[%c16_32, %c128_33] : memref<80x512xbf16, #tpu.memory_space<vmem>>, vector<8x126xbf16>
    tpu.vector_store %arg6[%c16_32, %c128_33], %22 {strides = array<i32>} : memref<80x512xbf16, #tpu.memory_space<vmem>>, vector<8x126xbf16>,
    %c24_34 = arith.constant 24 : index
    %c128_35 = arith.constant 128 : index
    %24 = vector.load %arg6[%c24_34, %c128_35] : memref<80x512xbf16, #tpu.memory_space<vmem>>, vector<8x128xbf16>
    tpu.vector_store %arg6[%c24_34, %c128_35], %10 {strides = array<i32>} : memref<80x512xbf16, #tpu.memory_space<vmem>>, vector<8x128xbf16>,
    %c32_36 = arith.constant 32 : index
    %c128_37 = arith.constant 128 : index
    %25 = vector.load %arg6[%c32_36, %c128_37] : memref<80x512xbf16, #tpu.memory_space<vmem>>, vector<8x126xbf16>
    tpu.vector_store %arg6[%c32_36, %c128_37], %12 {strides = array<i32>} : memref<80x512xbf16, #tpu.memory_space<vmem>>, vector<8x126xbf16>,
    %c24_38 = arith.constant 24 : index
    %c2_39 = arith.constant 2 : index
    %26 = vector.load %arg0[%c24_38, %c2_39] : memref<32x128xbf16, #tpu.memory_space<vmem>>, vector<8x126xbf16>
    %c40_40 = arith.constant 40 : index
    %c128_41 = arith.constant 128 : index
    %27 = vector.load %arg6[%c40_40, %c128_41] : memref<80x512xbf16, #tpu.memory_space<vmem>>, vector<8x126xbf16>
    tpu.vector_store %arg6[%c40_40, %c128_41], %26 {strides = array<i32>} : memref<80x512xbf16, #tpu.memory_space<vmem>>, vector<8x126xbf16>,
    %c48_42 = arith.constant 48 : index
    %c128_43 = arith.constant 128 : index
    %28 = vector.load %arg6[%c48_42, %c128_43] : memref<80x512xbf16, #tpu.memory_space<vmem>>, vector<8x122xbf16>
    tpu.vector_store %arg6[%c48_42, %c128_43], %16 {strides = array<i32>} : memref<80x512xbf16, #tpu.memory_space<vmem>>, vector<8x122xbf16>,
    %c56_44 = arith.constant 56 : index
    %c128_45 = arith.constant 128 : index
    %29 = vector.load %arg6[%c56_44, %c128_45] : memref<80x512xbf16, #tpu.memory_space<vmem>>, vector<8x120xbf16>
    tpu.vector_store %arg6[%c56_44, %c128_45], %18 {strides = array<i32>} : memref<80x512xbf16, #tpu.memory_space<vmem>>, vector<8x120xbf16>,
    %c8_46 = arith.constant 8 : index
    %c8_47 = arith.constant 8 : index
    %30 = vector.load %arg0[%c8_46, %c8_47] : memref<32x128xbf16, #tpu.memory_space<vmem>>, vector<8x120xbf16>
    %c64_48 = arith.constant 64 : index
    %c128_49 = arith.constant 128 : index
    %31 = vector.load %arg6[%c64_48, %c128_49] : memref<80x512xbf16, #tpu.memory_space<vmem>>, vector<8x120xbf16>
    tpu.vector_store %arg6[%c64_48, %c128_49], %30 {strides = array<i32>} : memref<80x512xbf16, #tpu.memory_space<vmem>>, vector<8x120xbf16>,
    %c0_50 = arith.constant 0 : index
    %c256 = arith.constant 256 : index
    %32 = vector.load %arg6[%c0_50, %c256] : memref<80x512xbf16, #tpu.memory_space<vmem>>, vector<8x128xbf16>
    tpu.vector_store %arg6[%c0_50, %c256], %8 {strides = array<i32>} : memref<80x512xbf16, #tpu.memory_space<vmem>>, vector<8x128xbf16>,
    %c8_51 = arith.constant 8 : index
    %c256_52 = arith.constant 256 : index
    %33 = vector.load %arg6[%c8_51, %c256_52] : memref<80x512xbf16, #tpu.memory_space<vmem>>, vector<8x128xbf16>
    tpu.vector_store %arg6[%c8_51, %c256_52], %10 {strides = array<i32>} : memref<80x512xbf16, #tpu.memory_space<vmem>>, vector<8x128xbf16>,
    %c16_53 = arith.constant 16 : index
    %c256_54 = arith.constant 256 : index
    %34 = vector.load %arg6[%c16_53, %c256_54] : memref<80x512xbf16, #tpu.memory_space<vmem>>, vector<8x126xbf16>
    tpu.vector_store %arg6[%c16_53, %c256_54], %12 {strides = array<i32>} : memref<80x512xbf16, #tpu.memory_space<vmem>>, vector<8x126xbf16>,
    %c24_55 = arith.constant 24 : index
    %c256_56 = arith.constant 256 : index
    %35 = vector.load %arg6[%c24_55, %c256_56] : memref<80x512xbf16, #tpu.memory_space<vmem>>, vector<8x122xbf16>
    tpu.vector_store %arg6[%c24_55, %c256_56], %14 {strides = array<i32>} : memref<80x512xbf16, #tpu.memory_space<vmem>>, vector<8x122xbf16>,
    %c32_57 = arith.constant 32 : index
    %c256_58 = arith.constant 256 : index
    %36 = vector.load %arg6[%c32_57, %c256_58] : memref<80x512xbf16, #tpu.memory_space<vmem>>, vector<8x122xbf16>
    tpu.vector_store %arg6[%c32_57, %c256_58], %16 {strides = array<i32>} : memref<80x512xbf16, #tpu.memory_space<vmem>>, vector<8x122xbf16>,
    %c40_59 = arith.constant 40 : index
    %c256_60 = arith.constant 256 : index
    %37 = vector.load %arg6[%c40_59, %c256_60] : memref<80x512xbf16, #tpu.memory_space<vmem>>, vector<8x120xbf16>
    tpu.vector_store %arg6[%c40_59, %c256_60], %18 {strides = array<i32>} : memref<80x512xbf16, #tpu.memory_space<vmem>>, vector<8x120xbf16>,
    %c16_61 = arith.constant 16 : index
    %c6_62 = arith.constant 6 : index
    %38 = vector.load %arg0[%c16_61, %c6_62] : memref<32x128xbf16, #tpu.memory_space<vmem>>, vector<8x122xbf16>
    %c48_63 = arith.constant 48 : index
    %c256_64 = arith.constant 256 : index
    %39 = vector.load %arg6[%c48_63, %c256_64] : memref<80x512xbf16, #tpu.memory_space<vmem>>, vector<8x122xbf16>
    tpu.vector_store %arg6[%c48_63, %c256_64], %38 {strides = array<i32>} : memref<80x512xbf16, #tpu.memory_space<vmem>>, vector<8x122xbf16>,
    %c24_65 = arith.constant 24 : index
    %c6_66 = arith.constant 6 : index
    %40 = vector.load %arg0[%c24_65, %c6_66] : memref<32x128xbf16, #tpu.memory_space<vmem>>, vector<8x122xbf16>
    %c56_67 = arith.constant 56 : index
    %c256_68 = arith.constant 256 : index
    %41 = vector.load %arg6[%c56_67, %c256_68] : memref<80x512xbf16, #tpu.memory_space<vmem>>, vector<8x122xbf16>
    tpu.vector_store %arg6[%c56_67, %c256_68], %40 {strides = array<i32>} : memref<80x512xbf16, #tpu.memory_space<vmem>>, vector<8x122xbf16>,
    %c16_69 = arith.constant 16 : index
    %c8_70 = arith.constant 8 : index
    %42 = vector.load %arg0[%c16_69, %c8_70] : memref<32x128xbf16, #tpu.memory_space<vmem>>, vector<8x120xbf16>
    %c64_71 = arith.constant 64 : index
    %c256_72 = arith.constant 256 : index
    %43 = vector.load %arg6[%c64_71, %c256_72] : memref<80x512xbf16, #tpu.memory_space<vmem>>, vector<8x120xbf16>
    tpu.vector_store %arg6[%c64_71, %c256_72], %42 {strides = array<i32>} : memref<80x512xbf16, #tpu.memory_space<vmem>>, vector<8x120xbf16>,
    %c0_73 = arith.constant 0 : index
    %c384 = arith.constant 384 : index
    %44 = vector.load %arg6[%c0_73, %c384] : memref<80x512xbf16, #tpu.memory_space<vmem>>, vector<8x128xbf16>
    tpu.vector_store %arg6[%c0_73, %c384], %10 {strides = array<i32>} : memref<80x512xbf16, #tpu.memory_space<vmem>>, vector<8x128xbf16>,
    %c8_74 = arith.constant 8 : index
    %c384_75 = arith.constant 384 : index
    %45 = vector.load %arg6[%c8_74, %c384_75] : memref<80x512xbf16, #tpu.memory_space<vmem>>, vector<8x126xbf16>
    tpu.vector_store %arg6[%c8_74, %c384_75], %12 {strides = array<i32>} : memref<80x512xbf16, #tpu.memory_space<vmem>>, vector<8x126xbf16>,
    %c16_76 = arith.constant 16 : index
    %c384_77 = arith.constant 384 : index
    %46 = vector.load %arg6[%c16_76, %c384_77] : memref<80x512xbf16, #tpu.memory_space<vmem>>, vector<8x126xbf16>
    tpu.vector_store %arg6[%c16_76, %c384_77], %26 {strides = array<i32>} : memref<80x512xbf16, #tpu.memory_space<vmem>>, vector<8x126xbf16>,
    %c24_78 = arith.constant 24 : index
    %c384_79 = arith.constant 384 : index
    %47 = vector.load %arg6[%c24_78, %c384_79] : memref<80x512xbf16, #tpu.memory_space<vmem>>, vector<8x122xbf16>
    tpu.vector_store %arg6[%c24_78, %c384_79], %16 {strides = array<i32>} : memref<80x512xbf16, #tpu.memory_space<vmem>>, vector<8x122xbf16>,
    %c32_80 = arith.constant 32 : index
    %c384_81 = arith.constant 384 : index
    %48 = vector.load %arg6[%c32_80, %c384_81] : memref<80x512xbf16, #tpu.memory_space<vmem>>, vector<8x120xbf16>
    tpu.vector_store %arg6[%c32_80, %c384_81], %18 {strides = array<i32>} : memref<80x512xbf16, #tpu.memory_space<vmem>>, vector<8x120xbf16>,
    %c40_82 = arith.constant 40 : index
    %c384_83 = arith.constant 384 : index
    %49 = vector.load %arg6[%c40_82, %c384_83] : memref<80x512xbf16, #tpu.memory_space<vmem>>, vector<8x120xbf16>
    tpu.vector_store %arg6[%c40_82, %c384_83], %30 {strides = array<i32>} : memref<80x512xbf16, #tpu.memory_space<vmem>>, vector<8x120xbf16>,
    %c48_84 = arith.constant 48 : index
    %c384_85 = arith.constant 384 : index
    %50 = vector.load %arg6[%c48_84, %c384_85] : memref<80x512xbf16, #tpu.memory_space<vmem>>, vector<8x122xbf16>
    tpu.vector_store %arg6[%c48_84, %c384_85], %40 {strides = array<i32>} : memref<80x512xbf16, #tpu.memory_space<vmem>>, vector<8x122xbf16>,
    %c56_86 = arith.constant 56 : index
    %c384_87 = arith.constant 384 : index
    %51 = vector.load %arg6[%c56_86, %c384_87] : memref<80x512xbf16, #tpu.memory_space<vmem>>, vector<8x120xbf16>
    tpu.vector_store %arg6[%c56_86, %c384_87], %42 {strides = array<i32>} : memref<80x512xbf16, #tpu.memory_space<vmem>>, vector<8x120xbf16>,
    %c24_88 = arith.constant 24 : index
    %c8_89 = arith.constant 8 : index
    %52 = vector.load %arg0[%c24_88, %c8_89] : memref<32x128xbf16, #tpu.memory_space<vmem>>, vector<8x120xbf16>
    %c64_90 = arith.constant 64 : index
    %c384_91 = arith.constant 384 : index
    %53 = vector.load %arg6[%c64_90, %c384_91] : memref<80x512xbf16, #tpu.memory_space<vmem>>, vector<8x120xbf16>
    tpu.vector_store %arg6[%c64_90, %c384_91], %52 {strides = array<i32>} : memref<80x512xbf16, #tpu.memory_space<vmem>>, vector<8x120xbf16>,
    %c0_92 = arith.constant 0 : index
    %c0_93 = arith.constant 0 : index
    %54 = vector.load %arg1[%c0_92, %c0_93] : memref<16x80xbf16, #tpu.memory_space<vmem>>, vector<16x80xbf16>
    %c0_94 = arith.constant 0 : index
    %c0_95 = arith.constant 0 : index
    %55 = vector.load %arg6[%c0_94, %c0_95] : memref<80x512xbf16, #tpu.memory_space<vmem>>, vector<80x512xbf16>
    %cst_96 = arith.constant dense<0.000000e+00> : vector<16x512xf32>
    %56 = tpu.matmul %54, %55, %cst_96 {dimension_numbers = #tpu.dot_dimension_numbers<[1], [0], [0], [1], [0, 0, 1, 1], [], []>} : vector<16x80xbf16>, vector<80x512xbf16>, vector<16x512xf32> -> vector<16x512xf32>
    %c0_97 = arith.constant 0 : index
    %c0_98 = arith.constant 0 : index
    %57 = vector.load %arg4[%c0_97, %c0_98] : memref<1x512xf32, #tpu.memory_space<vmem>>, vector<1x512xf32>
    %58 = vector.broadcast %57 : vector<1x512xf32> to vector<16x512xf32>
    %59 = arith.mulf %56, %58 : vector<16x512xf32>
    %cst_99 = arith.constant dense<0.000000e+00> : vector<16xf32>
    %60 = vector.multi_reduction <add>, %59, %cst_99 [1] : vector<16x512xf32> to vector<16xf32>
    %61 = vector.shape_cast %60 : vector<16xf32> to vector<16x1xf32>
    %cst_100 = arith.constant 3.125000e-02 : f32
    %62 = vector.broadcast %cst_100 : f32 to vector<16x1xf32>
    %63 = arith.mulf %61, %62 : vector<16x1xf32>
    %64 = arith.mulf %59, %59 : vector<16x512xf32>
    %cst_101 = arith.constant dense<0.000000e+00> : vector<16xf32>
    %65 = vector.multi_reduction <add>, %64, %cst_101 [1] : vector<16x512xf32> to vector<16xf32>
    %66 = vector.shape_cast %65 : vector<16xf32> to vector<16x1xf32>
    %cst_102 = arith.constant 3.125000e-02 : f32
    %67 = vector.broadcast %cst_102 : f32 to vector<16x1xf32>
    %68 = arith.mulf %66, %67 : vector<16x1xf32>
    %69 = arith.mulf %63, %63 : vector<16x1xf32>
    %70 = arith.subf %68, %69 : vector<16x1xf32>
    %cst_103 = arith.constant 0.000000e+00 : f32
    %71 = vector.broadcast %cst_103 : f32 to vector<16x1xf32>
    %72 = arith.maximumf %70, %71 : vector<16x1xf32>
    %c0_104 = arith.constant 0 : index
    %c0_105 = arith.constant 0 : index
    %73 = vector.load %arg2[%c0_104, %c0_105] : memref<16x1xf32, #tpu.memory_space<vmem>>, vector<16x1xf32>
    %cst_106 = arith.constant 9.99999974E-6 : f32
    %74 = vector.broadcast %cst_106 : f32 to vector<16x1xf32>
    %75 = arith.addf %72, %74 : vector<16x1xf32>
    %76 = math.rsqrt %75 : vector<16x1xf32>
    %77 = arith.mulf %73, %76 : vector<16x1xf32>
    %c0_107 = arith.constant 0 : index
    %c0_108 = arith.constant 0 : index
    %78 = vector.load %arg3[%c0_107, %c0_108] : memref<16x1xf32, #tpu.memory_space<vmem>>, vector<16x1xf32>
    %79 = arith.mulf %77, %63 : vector<16x1xf32>
    %80 = arith.subf %78, %79 : vector<16x1xf32>
    %81 = vector.broadcast %77 : vector<16x1xf32> to vector<16x512xf32>
    %82 = arith.mulf %56, %81 : vector<16x512xf32>
    %83 = vector.broadcast %80 : vector<16x1xf32> to vector<16x512xf32>
    %84 = arith.addf %82, %83 : vector<16x512xf32>
    %cst_109 = arith.constant 0.000000e+00 : f32
    %85 = vector.broadcast %cst_109 : f32 to vector<16x512xf32>
    %86 = arith.maximumf %84, %85 : vector<16x512xf32>
    %87 = vector.extract_strided_slice %86 {offsets = [0, 0], sizes = [16, 128], strides = [1, 1]} : vector<16x512xf32> to vector<16x128xf32>
    %88 = vector.extract_strided_slice %86 {offsets = [0, 128], sizes = [16, 128], strides = [1, 1]} : vector<16x512xf32> to vector<16x128xf32>
    %89 = arith.maximumf %87, %88 : vector<16x128xf32>
    %90 = vector.extract_strided_slice %86 {offsets = [0, 256], sizes = [16, 128], strides = [1, 1]} : vector<16x512xf32> to vector<16x128xf32>
    %91 = arith.maximumf %89, %90 : vector<16x128xf32>
    %92 = vector.extract_strided_slice %86 {offsets = [0, 384], sizes = [16, 128], strides = [1, 1]} : vector<16x512xf32> to vector<16x128xf32>
    %93 = arith.maximumf %91, %92 : vector<16x128xf32>
    %c0_110 = arith.constant 0 : index
    %c0_111 = arith.constant 0 : index
    %94 = vector.load %arg5[%c0_110, %c0_111] : memref<16x128xf32, #tpu.memory_space<vmem>>, vector<16x128xf32>
    tpu.vector_store %arg5[%c0_110, %c0_111], %93 {strides = array<i32>} : memref<16x128xf32, #tpu.memory_space<vmem>>, vector<16x128xf32>,
    return
  }
}

module attributes {stable_mosaic.version = 11 : i64} {
  func.func @_mlp_head_kernel(%arg0: memref<64x2xbf16, #tpu.memory_space<vmem>>, %arg1: memref<32x64xbf16, #tpu.memory_space<vmem>>, %arg2: memref<32x1xf32, #tpu.memory_space<vmem>>, %arg3: memref<10x32xbf16, #tpu.memory_space<vmem>>, %arg4: memref<10x1xf32, #tpu.memory_space<vmem>>, %arg5: memref<10x2xf32, #tpu.memory_space<vmem>>) attributes {dimension_semantics = [], scalar_prefetch = 0 : i64, scratch_operands = 0 : i64, tpu.core_type = #tpu.core_type<tc>} {
    %c0 = arith.constant 0 : index
    %c0_0 = arith.constant 0 : index
    %0 = vector.load %arg0[%c0, %c0_0] : memref<64x2xbf16, #tpu.memory_space<vmem>>, vector<64x2xbf16>
    %c0_1 = arith.constant 0 : index
    %c0_2 = arith.constant 0 : index
    %1 = vector.load %arg1[%c0_1, %c0_2] : memref<32x64xbf16, #tpu.memory_space<vmem>>, vector<32x64xbf16>
    %cst = arith.constant dense<0.000000e+00> : vector<32x2xf32>
    %2 = tpu.matmul %1, %0, %cst {dimension_numbers = #tpu.dot_dimension_numbers<[1], [0], [0], [1], [0, 0, 1, 1], [], []>} : vector<32x64xbf16>, vector<64x2xbf16>, vector<32x2xf32> -> vector<32x2xf32>
    %c0_3 = arith.constant 0 : index
    %c0_4 = arith.constant 0 : index
    %3 = vector.load %arg2[%c0_3, %c0_4] : memref<32x1xf32, #tpu.memory_space<vmem>>, vector<32x1xf32>
    %4 = vector.broadcast %3 : vector<32x1xf32> to vector<32x2xf32>
    %5 = arith.addf %2, %4 : vector<32x2xf32>
    %cst_5 = arith.constant 0.000000e+00 : f32
    %6 = vector.broadcast %cst_5 : f32 to vector<32x2xf32>
    %7 = arith.maximumf %5, %6 : vector<32x2xf32>
    %8 = arith.truncf %7 : vector<32x2xf32> to vector<32x2xbf16>
    %c0_6 = arith.constant 0 : index
    %c0_7 = arith.constant 0 : index
    %9 = vector.load %arg3[%c0_6, %c0_7] : memref<10x32xbf16, #tpu.memory_space<vmem>>, vector<10x32xbf16>
    %cst_8 = arith.constant dense<0.000000e+00> : vector<10x2xf32>
    %10 = tpu.matmul %9, %8, %cst_8 {dimension_numbers = #tpu.dot_dimension_numbers<[1], [0], [0], [1], [0, 0, 1, 1], [], []>} : vector<10x32xbf16>, vector<32x2xbf16>, vector<10x2xf32> -> vector<10x2xf32>
    %c0_9 = arith.constant 0 : index
    %c0_10 = arith.constant 0 : index
    %11 = vector.load %arg4[%c0_9, %c0_10] : memref<10x1xf32, #tpu.memory_space<vmem>>, vector<10x1xf32>
    %12 = vector.broadcast %11 : vector<10x1xf32> to vector<10x2xf32>
    %13 = arith.addf %10, %12 : vector<10x2xf32>
    %c0_11 = arith.constant 0 : index
    %c0_12 = arith.constant 0 : index
    %14 = vector.load %arg5[%c0_11, %c0_12] : memref<10x2xf32, #tpu.memory_space<vmem>>, vector<10x2xf32>
    tpu.vector_store %arg5[%c0_11, %c0_12], %13 {strides = array<i32>} : memref<10x2xf32, #tpu.memory_space<vmem>>, vector<10x2xf32>,
    return
  }
}

</mosaic_0001>

<bundles_post_ra>
// kernel: tile.13
= control target key start
LH: loop header
LB: loop body
LE: loop exit
PB: predicated region body
PF: predicated region fallthrough
CT: control target
= control target key end

     0   :  { %s22_s0 = inlined_call_operand.vmem [shape: f32[128], index: 0, kind: input, shape index: {}]   ;;  %s23_s1 = inlined_call_operand.vmem [shape: f32[4,128], index: 1, kind: output, shape index: {}]  }
   0x1   :  { %v4_v0 = vld [vmem:[%s22_s0] ss:$0 sm:$0xff] }
   0x2   :  { %5 = vst [vmem:[%s23_s1] sm:$0xf] %v4_v0 }

// kernel: _lambda_.5
= control target key start
LH: loop header
LB: loop body
LE: loop exit
PB: predicated region body
PF: predicated region fallthrough
CT: control target
= control target key end

     0   :  { %v214_v1 = vmov 0   ;;  %vm91_vm0 = vcmask 523264   ;;  %vm142_vm1 = vcmask 261120   ;;  %vm160_vm2 = vcmask 15360   ;;  %s293_s0 = inlined_call_operand.vmem [shape: bf16[64,2], index: 0, kind: input, shape index: {}]   ;;  %s294_s2 = inlined_call_operand.vmem [shape: f32[32,1], index: 2, kind: input, shape index: {}]   ;;  %s295_s1 = inlined_call_operand.vmem [shape: bf16[32,64], index: 1, kind: input, shape index: {}]   ;;  %s296_s4 = inlined_call_operand.vmem [shape: f32[10,1], index: 4, kind: input, shape index: {}]   ;;  %s297_s3 = inlined_call_operand.vmem [shape: bf16[10,32], index: 3, kind: input, shape index: {}]   ;;  %s298_s5 = inlined_call_operand.vmem [shape: f32[10,2], index: 5, kind: output, shape index: {}]  }
   0x1   :  { %v202_v0 = vld [vmem:[%s293_s0 + $0x18] sm:$0xff]  ;;  %211 = vset.pattern.permute.xlu0 %v214_v1  ;;  %212 = vset.pattern.permute.xlu1 %v214_v1  ;;  %v201_v2 = vld [vmem:[%s293_s0 + $0x10] sm:$0xff]  ;;  %v33_v4 = vld [vmem:[%s294_s2] sm:$0xff]  ;;  %vm162_vm3 = vcmask 9216  }
   0x2   :  { %213 = vset.pattern.permute.xlu2 %v214_v1  ;;  %206 = vmatpush.bf16.msra.mxu2 %v202_v0  ;;  %v35_v3 = vld [vmem:[%s294_s2 + $0x10] sm:$0xff]  ;;  %v200_v5 = vld [vmem:[%s293_s0 + $0x8] sm:$0xff]  ;;  %v36_v6 = vld [vmem:[%s294_s2 + $0x18] sm:$0xff] }
   0x3   :  { %102 = vmatpush.bf16.msra.mxu0 %v202_v0  ;;  %49 = vperm.xlu0 %211, %v35_v3   ;;  %v34_v7 = vld [vmem:[%s294_s2 + $0x8] sm:$0xff]  ;;  %v199_v8 = vld [vmem:[%s293_s0] sm:$0xff] }
   0x4   :  { %39 = vperm.xlu1 %212, %v33_v4   ;;  %v204_v9 = vld [vmem:[%s295_s1 + $0x8] sm:$0xff]  ;;  %v203_v10 = vld [vmem:[%s295_s1] sm:$0xff] }
   0x5   :  { %v125_v11 = vld [vmem:[%s296_s4] sm:$0xff]  ;;  %v126_v14 = vld [vmem:[%s296_s4 + $0x8] sm:$0x3] }
   0x6   :  { %207 = vmatpush.bf16.msra.mxu2 %v201_v2  ;;  %129 = vperm.xlu2 %213, %v125_v11   ;;  %v196_v30 = vld [vmem:[%s297_s3] sm:$0xf]  ;;  %v205_v31 = vld [vmem:[%s297_s3] sm:$0x10] }
   0x7   :  { %103 = vmatpush.bf16.msra.mxu0 %v201_v2  ;;  %v197_v33 = vor.u32 %v205_v31, %v196_v30 }
   0xa   :  { %208 = vmatpush.bf16.msra.mxu2 %v200_v5 }
   0xb   :  { %104 = vmatpush.bf16.msra.mxu0 %v200_v5  ;;  %54 = vperm.xlu0 %211, %v36_v6  }
   0xc   :  { %44 = vperm.xlu1 %212, %v34_v7  }
   0xe   :  { %209 = vmatpush.bf16.msra.mxu2 %v199_v8  ;;  %134 = vperm.xlu2 %213, %v126_v14  }
   0xf   :  { %105 = vmatpush.bf16.msra.mxu0 %v199_v8 }
  0x11   :  { %193 = vmatmul.msk.bf16.vlgmr.msra.gmra.mxu2 %vm91_vm0, %v204_v9 }
  0x12   :  { %192 = vmatmul.msk.bf16.vlgmr.msra.gmra.mxu0 %vm91_vm0, %v203_v10 }
  0x60   :  { %v130_v34 = vpop.permute.xlu2 %129 }
  0x68   :  { %v135_v37 = vpop.permute.xlu2 %134 }
  0x75   :  { %v50_v15 = vpop.permute.xlu0 %49 }
  0x76   :  { %v40_v12 = vpop.permute.xlu1 %39 }
  0x7d   :  { %v55_v20 = vpop.permute.xlu0 %54 }
  0x7e   :  { %v45_v17 = vpop.permute.xlu1 %44 }
  0x8f   :  { %v107_v13 = vpop.f32.mrf.mxu0 }
  0x90   :  { %v108_v22 = vadd.f32 %v107_v13, %v40_v12 }
  0x92   :  { %v117_v27 = vmax.f32 %v108_v22, 0.0 }
  0x94   :  { %v112_v16 = vpop.f32.mrf.mxu2 }
  0x95   :  { %v113_v19 = vadd.f32 %v112_v16, %v50_v15 }
  0x97   :  { %v109_v18 = vpop.f32.mrf.mxu0  ;;  %v119_v25 = vmax.f32 %v113_v19, 0.0 }
  0x98   :  { %v110_v23 = vadd.f32 %v109_v18, %v45_v17 }
  0x9a   :  { %v118_v28 = vmax.f32 %v110_v23, 0.0 }
  0x9c   :  { %v114_v21 = vpop.f32.mrf.mxu2  ;;  %v121_v32 = vpack.c.bf16 %v118_v28, %v117_v27 }
  0x9d   :  { %v115_v24 = vadd.f32 %v114_v21, %v55_v20 }
  0x9f   :  { %v120_v26 = vmax.f32 %v115_v24, 0.0 }
  0xa1   :  { %v122_v29 = vpack.c.bf16 %v120_v26, %v119_v25 }
  0xa3   :  { %152 = vmatpush.bf16.msra.mxu1 %v122_v29 }
  0xa7   :  { %153 = vmatpush.bf16.msra.mxu1 %v121_v32 }
  0xaa   :  { %198 = vmatmul.msk.bf16.vlgmr.msra.gmra.mxu1 %vm142_vm1, %v197_v33 }
 0x127   :  { %v155_v35 = vpop.f32.mrf.mxu1 }
 0x128   :  { %v156_v36 = vadd.f32 %v155_v35, %v130_v34 }
 0x12a   :  { %161 = vst.msk [vmem:[%s298_s5] sm:$0xff] %vm160_vm2, %v156_v36 }
 0x12f   :  { %v157_v38 = vpop.f32.mrf.mxu1 }
 0x130   :  { %v158_v39 = vadd.f32 %v157_v38, %v135_v37 }
 0x132   :  { %163 = vst.msk [vmem:[%s298_s5 + $0x8] sm:$0x3] %vm162_vm3, %v158_v39 }

// kernel: _lambda_.4
= control target key start
LH: loop header
LB: loop body
LE: loop exit
PB: predicated region body
PF: predicated region fallthrough
CT: control target
= control target key end

     0   :  { %v595_v2 = vmov 0   ;;  %s596_s22 = smov 120   ;;  %s597_s25 = smov 122   ;;  %vm67_vm0 = vcmask 994304   ;;  %vm50_vm1 = vcmask 1027072   ;;  %vm80_vm2 = vcmask 977920   ;;  %s764_s0 = inlined_call_operand.vmem [shape: bf16[32,128], index: 0, kind: input, shape index: {}]   ;;  %s765_s1 = inlined_call_operand.vmem [shape: bf16[16,80], index: 1, kind: input, shape index: {}]   ;;  %s766_s4 = inlined_call_operand.vmem [shape: f32[1,512], index: 4, kind: input, shape index: {}]   ;;  %s767_s2 = inlined_call_operand.vmem [shape: f32[16,1], index: 2, kind: input, shape index: {}]   ;;  %s768_s3 = inlined_call_operand.vmem [shape: f32[16,1], index: 3, kind: input, shape index: {}]   ;;  %s769_s5 = inlined_call_operand.vmem [shape: f32[16,128], index: 5, kind: output, shape index: {}]  }
   0x1   :  { %v124_v0 = vld [vmem:[%s764_s0 + $0x8] sm:$0xf]  ;;  %v75_v1 = vld [vmem:[%s764_s0] sm:$0xf]  ;;  %588 = vset.pattern.permute.xlu0 %v595_v2  ;;  %590 = vset.pattern.permute.xlu2 %v595_v2  ;;  %34 = vst [vmem:[#allocation2 + $0x68] sm:$0xff] %v595_v2  ;;  %s598_s13 = smov 126  }
   0x2   :  { %126 = vrot.lane.b32.xlu0 %v124_v0, %s596_s22  ;;  %77 = vrot.lane.b32.xlu1 %v75_v1, %s596_s22  ;;  %v112_v3 = vld [vmem:[%s764_s0 + $0x8] sm:$0xf]  ;;  %21 = vst [vmem:[#allocation2] sm:$0xff] %v595_v2  ;;  %v138_v4 = vld [vmem:[%s764_s0 + $0xc] sm:$0xf]  ;;  %vm271_vm3 = vcmask 654336  }
   0x3   :  { %114 = vrot.lane.b32.xlu2 %v112_v3, %s597_s25  ;;  %589 = vset.pattern.permute.xlu1 %v595_v2  ;;  %22 = vst [vmem:[#allocation2 + $0x8] sm:$0xff] %v595_v2  ;;  %v100_v5 = vld [vmem:[%s764_s0 + $0x4] sm:$0xf]  ;;  %v118_v6 = vld [vmem:[%s764_s0 + $0xc] sm:$0xf] }
   0x4   :  { %23 = vst [vmem:[#allocation2 + $0x10] sm:$0xff] %v595_v2  ;;  %v69_v7 = vld [vmem:[%s764_s0 + $0x4] sm:$0xf]  ;;  %v62_v8 = vld [vmem:[%s764_s0] sm:$0xf] }
   0x5   :  { %24 = vst [vmem:[#allocation2 + $0x18] sm:$0xff] %v595_v2  ;;  %v56_v9 = vld [vmem:[%s764_s0 + $0x8] sm:$0xf]  ;;  %v92_v10 = vld [vmem:[%s764_s0 + $0xc] sm:$0xf] }
   0x6   :  { %25 = vst [vmem:[#allocation2 + $0x20] sm:$0xff] %v595_v2  ;;  %v45_v11 = vld [vmem:[%s764_s0] sm:$0xf]  ;;  %v84_v12 = vld [vmem:[%s764_s0 + $0x4] sm:$0xf] }
   0x7   :  { %26 = vst [vmem:[#allocation2 + $0x28] sm:$0xff] %v595_v2  ;;  %v52_v15 = vld [vmem:[%s764_s0 + $0x8] sm:$0xf]  ;;  %v54_v16 = vld [vmem:[%s764_s0 + $0xc] sm:$0xf] }
   0x8   :  { %27 = vst [vmem:[#allocation2 + $0x30] sm:$0xff] %v595_v2  ;;  %v41_v20 = vld [vmem:[%s764_s0] sm:$0xf]  ;;  %v43_v21 = vld [vmem:[%s764_s0 + $0x4] sm:$0xf] }
   0x9   :  { %28 = vst [vmem:[#allocation2 + $0x38] sm:$0xff] %v595_v2 }
   0xa   :  { %140 = vrot.lane.b32.xlu0 %v138_v4, %s596_s22  ;;  %102 = vrot.lane.b32.xlu1 %v100_v5, %s596_s22  ;;  %29 = vst [vmem:[#allocation2 + $0x40] sm:$0xff] %v595_v2 }
   0xb   :  { %120 = vrot.lane.b32.xlu2 %v118_v6, %s597_s25  ;;  %30 = vst [vmem:[#allocation2 + $0x48] sm:$0xff] %v595_v2 }
   0xc   :  { %31 = vst [vmem:[#allocation2 + $0x50] sm:$0xff] %v595_v2 }
   0xd   :  { %32 = vst [vmem:[#allocation2 + $0x58] sm:$0xff] %v595_v2 }
   0xe   :  { %33 = vst [vmem:[#allocation2 + $0x60] sm:$0xff] %v595_v2 }
   0xf   :  { %35 = vst [vmem:[#allocation2 + $0x70] sm:$0xff] %v595_v2 }
  0x10   :  { %36 = vst [vmem:[#allocation2 + $0x78] sm:$0xff] %v595_v2 }
  0x11   :  { %37 = vst [vmem:[#allocation2 + $0x80] sm:$0xff] %v595_v2 }
  0x12   :  { %71 = vrot.lane.b32.xlu1 %v69_v7, %s597_s25  ;;  %64 = vrot.lane.b32.xlu0 %v62_v8, %s597_s25  ;;  %38 = vst [vmem:[#allocation2 + $0x88] sm:$0xff] %v595_v2 }
  0x13   :  { %58 = vrot.lane.b32.xlu2 %v56_v9, %s598_s13  ;;  %39 = vst [vmem:[#allocation2 + $0x90] sm:$0xff] %v595_v2 }
  0x14   :  { %40 = vst [vmem:[#allocation2 + $0x98] sm:$0xff] %v595_v2 }
  0x15   :  { %53 = vst [vmem:[#allocation2 + $0x30] sm:$0xf] %v52_v15 }
  0x16   :  { %55 = vst [vmem:[#allocation2 + $0x40] sm:$0xf] %v54_v16 }
  0x17   :  { %90 = vst [vmem:[#allocation2 + $0x34] sm:$0xf] %v54_v16 }
  0x18   :  { %106 = vst [vmem:[#allocation2 + $0x8] sm:$0xf] %v52_v15  ;;  %v563_v15 = vld [vmem:[%s765_s1] sm:$0xff] }
  0x19   :  { %107 = vst [vmem:[#allocation2 + $0x18] sm:$0xf] %v54_v16 }
  0x1a   :  { %94 = vrot.lane.b32.xlu0 %v92_v10, %s598_s13  ;;  %47 = vrot.lane.b32.xlu1 %v45_v11, %s598_s13  ;;  %130 = vst [vmem:[#allocation2 + $0xc] sm:$0xf] %v54_v16  ;;  %v582_v29 = vld [vmem:[#allocation2 + $0x8c] sm:$0xf0]  ;;  %v547_v35 = vld [vmem:[#allocation2 + $0x90] sm:$0xf0] }
  0x1b   :  { %86 = vrot.lane.b32.xlu2 %v84_v12, %s598_s13  ;;  %v583_v22 = vld [vmem:[#allocation2 + $0x94] sm:$0xf0]  ;;  %42 = vst [vmem:[#allocation2] sm:$0xf] %v41_v20  ;;  %v555_v34 = vld [vmem:[#allocation2 + $0x98] sm:$0xf0] }
  0x1c   :  { %44 = vst [vmem:[#allocation2 + $0x10] sm:$0xf] %v43_v21  ;;  %v570_v4 = vld [vmem:[#allocation2 + $0x2c] sm:$0xf0] }
  0x1d   :  { %82 = vst [vmem:[#allocation2 + $0x4] sm:$0xf] %v43_v21  ;;  %v513_v57 = vld [vmem:[#allocation2 + $0x40] sm:$0xf] }
  0x1e   :  { %v499_v7 = vld [vmem:[#allocation2 + $0x30] sm:$0xf0] }
  0x1f   :  { %v489_v63 = vld [vmem:[#allocation2 + $0x8] sm:$0xf] }
  0x20   :  { %v567_v0 = vld [vmem:[#allocation2 + $0x14] sm:$0xf0] }
  0x21   :  { %v490_v6 = vor.u32 %v567_v0, %v489_v63  ;;  %v565_v16 = vld [vmem:[#allocation2 + $0xc] sm:$0xf] }
  0x5d   :  { %v115_v13 = vpop.permute.xlu2 %114 }
  0x5e   :  { %117 = vst.msk [vmem:[#allocation2 + $0x68] sm:$0xf] %vm67_vm0, %v115_v13 }
  0x65   :  { %v121_v14 = vpop.permute.xlu2 %120  ;;  %v537_v23 = vld [vmem:[#allocation2 + $0x68] sm:$0xf] }
  0x66   :  { %123 = vst.msk [vmem:[#allocation2 + $0x78] sm:$0xf] %vm67_vm0, %v121_v14 }
  0x67   :  { %136 = vst.msk [vmem:[#allocation2 + $0x6c] sm:$0xf] %vm67_vm0, %v121_v14 }
  0x6d   :  { %v59_v17 = vpop.permute.xlu2 %58  ;;  %v579_v27 = vld [vmem:[#allocation2 + $0x74] sm:$0xf0] }
  0x6e   :  { %91 = vst.msk [vmem:[#allocation2 + $0x44] sm:$0xf] %vm50_vm1, %v59_v17  ;;  %v538_v31 = vor.u32 %v579_v27, %v537_v23  ;;  %v577_v42 = vld [vmem:[#allocation2 + $0x6c] sm:$0xf]  ;;  %v564_v23 = vld [vmem:[#allocation2 + $0x4] sm:$0xf] }
  0x6f   :  { %131 = vst.msk [vmem:[#allocation2 + $0x1c] sm:$0xf] %vm50_vm1, %v59_v17 }
  0x70   :  { %61 = vst.msk [vmem:[#allocation2 + $0x50] sm:$0xf] %vm50_vm1, %v59_v17 }
  0x71   :  { %108 = vst.msk [vmem:[#allocation2 + $0x28] sm:$0xf] %vm50_vm1, %v59_v17 }
  0x74   :  { %v127_v18 = vpop.permute.xlu0 %126  ;;  %v78_v19 = vpop.permute.xlu1 %77 }
  0x75   :  { %129 = vst.msk [vmem:[#allocation2 + $0x88] sm:$0xf] %vm80_vm2, %v127_v18  ;;  %v87_v30 = vpop.permute.xlu2 %86  ;;  %v572_v3 = vld [vmem:[#allocation2 + $0x44] sm:$0xf] }
  0x76   :  { %137 = vst.msk [vmem:[#allocation2 + $0x7c] sm:$0xf] %vm80_vm2, %v127_v18  ;;  %v491_v17 = vld [vmem:[#allocation2 + $0x18] sm:$0xf0]  ;;  %v481_v18 = vld [vmem:[#allocation2] sm:$0xf] }
  0x77   :  { %99 = vst.msk [vmem:[#allocation2 + $0x74] sm:$0xf] %vm80_vm2, %v78_v19  ;;  %v574_v60 = vld [vmem:[#allocation2 + $0x4c] sm:$0xf0]  ;;  %v494_v21 = vor.u32 %v565_v16, %v491_v17 }
  0x78   :  { %134 = vst.msk [vmem:[#allocation2 + $0x4c] sm:$0xf] %vm80_vm2, %v78_v19  ;;  %v505_v58 = vld [vmem:[#allocation2 + $0x28] sm:$0xf]  ;;  %v514_v2 = vor.u32 %v574_v60, %v513_v57 }
  0x79   :  { %81 = vst.msk [vmem:[#allocation2 + $0x80] sm:$0xf] %vm80_vm2, %v78_v19 }
  0x7a   :  { %111 = vst.msk [vmem:[#allocation2 + $0x58] sm:$0xf] %vm80_vm2, %v78_v19  ;;  %v566_v19 = vld [vmem:[#allocation2 + $0xc] sm:$0xf0] }
  0x7b   :  { %89 = vst.msk [vmem:[#allocation2 + $0x24] sm:$0xf] %vm50_vm1, %v87_v30 }
  0x7c   :  { %v141_v24 = vpop.permute.xlu0 %140  ;;  %v103_v25 = vpop.permute.xlu1 %102  ;;  %v553_v26 = vld [vmem:[#allocation2 + $0x88] sm:$0xf] }
  0x7d   :  { %143 = vst.msk [vmem:[#allocation2 + $0x8c] sm:$0xf] %vm80_vm2, %v141_v24  ;;  %v554_v28 = vor.u32 %v583_v22, %v553_v26  ;;  %v539_v43 = vld [vmem:[#allocation2 + $0x78] sm:$0xf0]  ;;  %v482_v22 = vor.u32 %v566_v19, %v481_v18  ;;  %v331_v26 = vld [vmem:[%s766_s4] sm:$0xf] }
  0x7e   :  { %105 = vst.msk [vmem:[#allocation2 + $0x84] sm:$0xf] %vm80_vm2, %v103_v25  ;;  %v542_v44 = vor.u32 %v577_v42, %v539_v43  ;;  %v531_v48 = vld [vmem:[#allocation2 + $0x70] sm:$0xf0]  ;;  %v335_v27 = vperm.slane %v331_v26, 2 }
  0x7f   :  { %135 = vst.msk [vmem:[#allocation2 + $0x5c] sm:$0xf] %vm80_vm2, %v103_v25  ;;  %306 = vmatpush.bf16.msra.mxu2 %v554_v28  ;;  %v573_v49 = vld [vmem:[#allocation2 + $0x4c] sm:$0xf]  ;;  %v333_v28 = vperm.slane %v331_v26, 0 }
  0x80   :  { %v545_v32 = vld [vmem:[#allocation2 + $0x80] sm:$0xf] }
  0x81   :  { %v546_v33 = vor.u32 %v582_v29, %v545_v32  ;;  %v575_v51 = vld [vmem:[#allocation2 + $0x54] sm:$0xf0]  ;;  %v334_v29 = vperm.slane %v331_v26, 1 }
  0x82   :  { %v568_v11 = vld [vmem:[#allocation2 + $0x24] sm:$0xf] }
  0x83   :  { %278 = vmatpush.bf16.msra.mxu0 %v546_v33  ;;  %307 = vmatpush.bf16.msra.mxu2 %v538_v31  ;;  %v502_v20 = vor.u32 %v568_v11, %v499_v7  ;;  %v336_v33 = vperm.slane %v331_v26, 3  ;;  %v387_v26 = vld [vmem:[%s767_s2] sm:$0xff] }
  0x84   :  { %v72_v36 = vpop.permute.xlu1 %71  ;;  %v65_v37 = vpop.permute.xlu0 %64  ;;  %v581_v38 = vld [vmem:[#allocation2 + $0x8c] sm:$0xf] }
  0x85   :  { %74 = vst.msk [vmem:[#allocation2 + $0x70] sm:$0xf] %vm67_vm0, %v72_v36  ;;  %v558_v39 = vor.u32 %v581_v38, %v555_v34  ;;  %v580_v40 = vld [vmem:[#allocation2 + $0x84] sm:$0xf] }
  0x86   :  { %110 = vst.msk [vmem:[#allocation2 + $0x48] sm:$0xf] %vm67_vm0, %v72_v36  ;;  %v550_v41 = vor.u32 %v580_v40, %v547_v35  ;;  %v523_v45 = vld [vmem:[#allocation2 + $0x58] sm:$0xf0] }
  0x87   :  { %98 = vst.msk [vmem:[#allocation2 + $0x64] sm:$0xf] %vm67_vm0, %v72_v36  ;;  %320 = vmatpush.bf16.msra.mxu3 %v558_v39  ;;  %v526_v52 = vor.u32 %v573_v49, %v523_v45 }
  0x88   :  { %133 = vst.msk [vmem:[#allocation2 + $0x3c] sm:$0xf] %vm67_vm0, %v72_v36  ;;  %292 = vmatpush.bf16.msra.mxu1 %v550_v41 }
  0x89   :  { %68 = vst.msk [vmem:[#allocation2 + $0x60] sm:$0xf] %vm67_vm0, %v65_v37 }
  0x8a   :  { %109 = vst.msk [vmem:[#allocation2 + $0x38] sm:$0xf] %vm67_vm0, %v65_v37 }
  0x8b   :  { %321 = vmatpush.bf16.msra.mxu3 %v542_v44 }
  0x8c   :  { %v95_v46 = vpop.permute.xlu0 %94  ;;  %v48_v47 = vpop.permute.xlu1 %47  ;;  %v578_v53 = vld [vmem:[#allocation2 + $0x6c] sm:$0xf0] }
  0x8d   :  { %97 = vst.msk [vmem:[#allocation2 + $0x54] sm:$0xf] %vm50_vm1, %v95_v46  ;;  %v521_v50 = vld [vmem:[#allocation2 + $0x48] sm:$0xf] }
  0x8e   :  { %132 = vst.msk [vmem:[#allocation2 + $0x2c] sm:$0xf] %vm50_vm1, %v95_v46  ;;  %v576_v54 = vld [vmem:[#allocation2 + $0x64] sm:$0xf]  ;;  %v522_v55 = vor.u32 %v575_v51, %v521_v50 }
  0x8f   :  { %51 = vst.msk [vmem:[#allocation2 + $0x20] sm:$0xf] %vm50_vm1, %v48_v47  ;;  %v534_v56 = vor.u32 %v576_v54, %v531_v48  ;;  %322 = vmatpush.bf16.msra.mxu3 %v526_v52  ;;  %v507_v10 = vld [vmem:[#allocation2 + $0x38] sm:$0xf0] }
  0x90   :  { %83 = vst.msk [vmem:[#allocation2 + $0x14] sm:$0xf] %vm50_vm1, %v48_v47  ;;  %v529_v59 = vld [vmem:[#allocation2 + $0x60] sm:$0xf]  ;;  %308 = vmatpush.bf16.msra.mxu2 %v522_v55 }
  0x91   :  { %v530_v61 = vor.u32 %v578_v53, %v529_v59  ;;  %293 = vmatpush.bf16.msra.mxu1 %v534_v56  ;;  %v571_v62 = vld [vmem:[#allocation2 + $0x34] sm:$0xf0] }
  0x92   :  { %v506_v1 = vor.u32 %v571_v62, %v505_v58 }
  0x93   :  { %279 = vmatpush.bf16.msra.mxu0 %v530_v61 }
  0x94   :  { %309 = vmatpush.bf16.msra.mxu2 %v506_v1  ;;  %v515_v5 = vld [vmem:[#allocation2 + $0x50] sm:$0xf0] }
  0x95   :  { %v518_v8 = vor.u32 %v572_v3, %v515_v5  ;;  %v569_v9 = vld [vmem:[#allocation2 + $0x2c] sm:$0xf] }
  0x96   :  { %v497_v12 = vld [vmem:[#allocation2 + $0x20] sm:$0xf]  ;;  %v510_v13 = vor.u32 %v569_v9, %v507_v10 }
  0x97   :  { %280 = vmatpush.bf16.msra.mxu0 %v514_v2  ;;  %v498_v14 = vor.u32 %v570_v4, %v497_v12  ;;  %294 = vmatpush.bf16.msra.mxu1 %v518_v8  ;;  %v483_v24 = vld [vmem:[#allocation2 + $0x10] sm:$0xf0] }
  0x98   :  { %310 = vmatpush.bf16.msra.mxu2 %v490_v6  ;;  %323 = vmatpush.bf16.msra.mxu3 %v510_v13  ;;  %v486_v25 = vor.u32 %v564_v23, %v483_v24 }
  0x9b   :  { %281 = vmatpush.bf16.msra.mxu0 %v498_v14  ;;  %561 = vmatmul.msk.bf16.vlgmr.msra.gmra.mxu2 %vm271_vm3, %v563_v15 }
  0x9c   :  { %295 = vmatpush.bf16.msra.mxu1 %v502_v20  ;;  %324 = vmatpush.bf16.msra.mxu3 %v494_v21 }
  0x9f   :  { %282 = vmatpush.bf16.msra.mxu0 %v482_v22  ;;  %562 = vmatmul.msk.bf16.vlgmr.msra.gmra.mxu3 %vm271_vm3, %v563_v15 }
  0xa0   :  { %296 = vmatpush.bf16.msra.mxu1 %v486_v25 }
  0xa2   :  { %559 = vmatmul.msk.bf16.vlgmr.msra.gmra.mxu0 %vm271_vm3, %v563_v15 }
  0xa3   :  { %560 = vmatmul.msk.bf16.vlgmr.msra.gmra.mxu1 %vm271_vm3, %v563_v15 }
 0x11e   :  { %v714_v30 = vpop.f32.mrf.mxu2 }
 0x11f   :  { %v716_v31 = vpop.f32.mrf.mxu0  ;;  %v343_v32 = vmul.f32 %v335_v27, %v714_v30 }
 0x120   :  { %v341_v34 = vmul.f32 %v333_v28, %v716_v31  ;;  %v720_v35 = vpop.f32.mrf.mxu1 }
 0x121   :  { %v342_v36 = vmul.f32 %v334_v29, %v720_v35  ;;  %v363_v39 = vmul.f32 %v343_v32, %v343_v32 }
 0x122   :  { %v361_v37 = vmul.f32 %v341_v34, %v341_v34  ;;  %v723_v38 = vpop.f32.mrf.mxu3 }
 0x123   :  { %v349_v40 = vadd.f32 %v342_v36, %v341_v34  ;;  %v362_v41 = vmul.f32 %v342_v36, %v342_v36  ;;  %v344_v42 = vmul.f32 %v336_v33, %v723_v38  ;;  %v413_v34 = vld [vmem:[%s768_s3] sm:$0xff] }
 0x125   :  { %v350_v43 = vadd.f32 %v349_v40, %v343_v32  ;;  %v364_v44 = vmul.f32 %v344_v42, %v344_v42  ;;  %v369_v45 = vadd.f32 %v362_v41, %v361_v37  ;;  %v388_v40 = vld [vmem:[%s767_s2 + $0x8] sm:$0xff] }
 0x126   :  { %v726_v46 = vpop.f32.mrf.mxu2 }
 0x127   :  { %v728_v47 = vpop.f32.mrf.mxu0  ;;  %v351_v48 = vadd.f32 %v350_v43, %v344_v42  ;;  %v370_v49 = vadd.f32 %v369_v45, %v363_v39  ;;  %v347_v52 = vmul.f32 %v335_v27, %v726_v46  ;;  %v414_v45 = vld [vmem:[%s768_s3 + $0x8] sm:$0xff] }
 0x128   :  { %v345_v50 = vmul.f32 %v333_v28, %v728_v47  ;;  %v731_v51 = vpop.f32.mrf.mxu1 }
 0x129   :  { %v346_v53 = vmul.f32 %v334_v29, %v731_v51  ;;  %352 = vadd.xlane.f32.xlu0 %v351_v48  ;;  %v371_v54 = vadd.f32 %v370_v49, %v364_v44  ;;  %v367_v60 = vmul.f32 %v347_v52, %v347_v52 }
 0x12a   :  { %v735_v55 = vpop.f32.mrf.mxu3  ;;  %v365_v56 = vmul.f32 %v345_v50, %v345_v50 }
 0x12b   :  { %v354_v57 = vadd.f32 %v346_v53, %v345_v50  ;;  %v366_v58 = vmul.f32 %v346_v53, %v346_v53  ;;  %v348_v59 = vmul.f32 %v336_v33, %v735_v55  ;;  %372 = vadd.xlane.f32.xlu2 %v371_v54 }
 0x12d   :  { %v374_v61 = vadd.f32 %v366_v58, %v365_v56  ;;  %v355_v62 = vadd.f32 %v354_v57, %v347_v52  ;;  %v368_v63 = vmul.f32 %v348_v59, %v348_v59 }
 0x12f   :  { %v356_v0 = vadd.f32 %v355_v62, %v348_v59  ;;  %v375_v1 = vadd.f32 %v374_v61, %v367_v60 }
 0x131   :  { %357 = vadd.xlane.f32.xlu1 %v356_v0  ;;  %v376_v2 = vadd.f32 %v375_v1, %v368_v63 }
 0x133   :  { %377 = vadd.xlane.f32.xlu2 %v376_v2 }
 0x19c   :  { %v353_v3 = vpop.xlane.xlu0 %352 }
 0x19d   :  { %v359_v4 = vmul.f32 0.03125, %v353_v3 }
 0x19e   :  { %v373_v5 = vpop.xlane.xlu2 %372 }
 0x19f   :  { %v381_v6 = vmul.f32 %v359_v4, %v359_v4  ;;  %v379_v7 = vmul.f32 0.03125, %v373_v5 }
 0x1a1   :  { %v383_v8 = vsub.f32 %v379_v7, %v381_v6 }
 0x1a3   :  { %v385_v9 = vmax.f32 %v383_v8, 0.0 }
 0x1a4   :  { %v358_v10 = vpop.xlane.xlu1 %357 }
 0x1a5   :  { %v389_v11 = vadd.f32 1e-05, %v385_v9  ;;  %v360_v12 = vmul.f32 0.03125, %v358_v10 }
 0x1a6   :  { %v378_v13 = vpop.xlane.xlu2 %377 }
 0x1a7   :  { %591 = vrsqrt.f32 %v389_v11  ;;  %v382_v14 = vmul.f32 %v360_v12, %v360_v12  ;;  %v380_v15 = vmul.f32 0.03125, %v378_v13  ;;  %vm397_vm5 = vweird.f32 %v389_v11 }
 0x1a9   :  { %v384_v16 = vsub.f32 %v380_v15, %v382_v14 }
 0x1ab   :  { %v386_v17 = vmax.f32 %v384_v16, 0.0 }
 0x1ad   :  { %v592_v18 = vpop.eup %591  ;;  %v390_v19 = vadd.f32 1e-05, %v386_v17 }
 0x1ae   :  { %v392_v20 = vmul.f32 %v592_v18, %v389_v11  ;;  %vm398_vm4 = vweird.f32 %v592_v18 }
 0x1af   :  { %593 = vrsqrt.f32 %v390_v19  ;;  %vm399_vm6 = vmor %vm397_vm5, %vm398_vm4  ;;  %vm407_vm8 = vweird.f32 %v390_v19 }
 0x1b0   :  { %v393_v21 = vmul.f32 %v592_v18, %v392_v20 }
 0x1b2   :  { %v394_v22 = vmul.f32 0.5, %v393_v21 }
 0x1b4   :  { %v395_v23 = vsub.f32 1.5, %v394_v22 }
 0x1b5   :  { %v594_v24 = vpop.eup %593 }
 0x1b6   :  { %v402_v25 = vmul.f32 %v594_v24, %v390_v19  ;;  %v396_v27 = vmul.f32 %v592_v18, %v395_v23  ;;  %vm408_vm7 = vweird.f32 %v594_v24 }
 0x1b7   :  { %vm409_vm9 = vmor %vm407_vm8, %vm408_vm7 }
 0x1b8   :  { %v403_v28 = vmul.f32 %v594_v24, %v402_v25  ;;  %v400_v29 = vsel %vm399_vm6, %v592_v18, %v396_v27 }
 0x1b9   :  { %v411_v32 = vmul.f32 %v400_v29, %v387_v26 }
 0x1ba   :  { %v404_v33 = vmul.f32 0.5, %v403_v28 }
 0x1bb   :  { %421 = vperm.xlu0 %588, %v411_v32   ;;  %v415_v36 = vmul.f32 %v411_v32, %v359_v4 }
 0x1bc   :  { %v405_v37 = vsub.f32 1.5, %v404_v33 }
 0x1bd   :  { %v417_v39 = vsub.f32 %v413_v34, %v415_v36 }
 0x1be   :  { %v406_v41 = vmul.f32 %v594_v24, %v405_v37 }
 0x1bf   :  { %439 = vperm.xlu2 %590, %v417_v39  }
 0x1c0   :  { %v410_v42 = vsel %vm409_vm9, %v594_v24, %v406_v41 }
 0x1c1   :  { %v412_v43 = vmul.f32 %v410_v42, %v388_v40 }
 0x1c3   :  { %426 = vperm.xlu1 %589, %v412_v43   ;;  %v416_v44 = vmul.f32 %v412_v43, %v360_v12 }
 0x1c5   :  { %v418_v48 = vsub.f32 %v414_v45, %v416_v44 }
 0x1cb   :  { %444 = vperm.xlu1 %589, %v418_v48  }
 0x219   :  { %v440_v56 = vpop.permute.xlu2 %439 }
 0x22d   :  { %v422_v49 = vpop.permute.xlu0 %421 }
 0x22e   :  { %v429_v50 = vmul.f32 %v422_v49, %v716_v31  ;;  %v430_v52 = vmul.f32 %v422_v49, %v720_v35  ;;  %v431_v53 = vmul.f32 %v422_v49, %v714_v30  ;;  %v432_v54 = vmul.f32 %v422_v49, %v723_v38 }
 0x230   :  { %v447_v57 = vadd.f32 %v440_v56, %v429_v50  ;;  %v448_v58 = vadd.f32 %v440_v56, %v430_v52  ;;  %v449_v59 = vadd.f32 %v440_v56, %v431_v53  ;;  %v450_v60 = vadd.f32 %v440_v56, %v432_v54 }
 0x232   :  { %v455_v61 = vmax.f32 %v447_v57, 0.0  ;;  %v456_v62 = vmax.f32 %v448_v58, 0.0  ;;  %v457_v63 = vmax.f32 %v449_v59, 0.0  ;;  %v458_v2 = vmax.f32 %v450_v60, 0.0 }
 0x234   :  { %v463_v0 = vmax.f32 %v455_v61, %v456_v62 }
 0x235   :  { %v427_v1 = vpop.permute.xlu1 %426 }
 0x236   :  { %v465_v3 = vmax.f32 %v463_v0, %v457_v63  ;;  %v433_v30 = vmul.f32 %v427_v1, %v728_v47  ;;  %v434_v31 = vmul.f32 %v427_v1, %v731_v51  ;;  %v435_v35 = vmul.f32 %v427_v1, %v726_v46 }
 0x237   :  { %v436_v5 = vmul.f32 %v427_v1, %v735_v55 }
 0x238   :  { %v467_v4 = vmax.f32 %v465_v3, %v458_v2 }
 0x23a   :  { %469 = vst [vmem:[%s769_s5] sm:$0xff] %v467_v4 }
 0x23d   :  { %v445_v38 = vpop.permute.xlu1 %444 }
 0x23e   :  { %v451_v6 = vadd.f32 %v445_v38, %v433_v30  ;;  %v452_v7 = vadd.f32 %v445_v38, %v434_v31  ;;  %v453_v8 = vadd.f32 %v445_v38, %v435_v35  ;;  %v454_v9 = vadd.f32 %v445_v38, %v436_v5 }
 0x240   :  { %v459_v10 = vmax.f32 %v451_v6, 0.0  ;;  %v460_v11 = vmax.f32 %v452_v7, 0.0  ;;  %v461_v12 = vmax.f32 %v453_v8, 0.0  ;;  %v462_v14 = vmax.f32 %v454_v9, 0.0 }
 0x242   :  { %v464_v13 = vmax.f32 %v459_v10, %v460_v11 }
 0x244   :  { %v466_v15 = vmax.f32 %v464_v13, %v461_v12 }
 0x246   :  { %v468_v16 = vmax.f32 %v466_v15, %v462_v14 }
 0x248   :  { %470 = vst [vmem:[%s769_s5 + $0x8] sm:$0xff] %v468_v16 }

// kernel: _lambda_.3
= control target key start
LH: loop header
LB: loop body
LE: loop exit
PB: predicated region body
PF: predicated region fallthrough
CT: control target
= control target key end

     0   :  { %s951_s24 = smov 92   ;;  %s952_s25 = smov 96   ;;  %v956_v29 = vmov 0   ;;  %vm186_vm0 = vcmask 779264   ;;  %vm193_vm1 = vcmask 781314   ;;  %vm214_vm2 = vcmask 746496   ;;  %s1277_s0 = inlined_call_operand.vmem [shape: bf16[16,128], index: 0, kind: input, shape index: {}]   ;;  %s1278_s1 = inlined_call_operand.vmem [shape: bf16[8,112], index: 1, kind: input, shape index: {}]   ;;  %s1279_s4 = inlined_call_operand.vmem [shape: f32[1,512], index: 4, kind: input, shape index: {}]   ;;  %s1280_s2 = inlined_call_operand.vmem [shape: f32[8,1], index: 2, kind: input, shape index: {}]   ;;  %s1281_s3 = inlined_call_operand.vmem [shape: f32[8,1], index: 3, kind: input, shape index: {}]   ;;  %s1282_s5 = inlined_call_operand.vmem [shape: f32[8,128], index: 5, kind: output, shape index: {}]  }
   0x1   :  { %v402_v0 = vld [vmem:[%s1277_s0 + $0x4] sm:$0x3]  ;;  %v209_v2 = vld [vmem:[%s1277_s0] sm:$0x3]  ;;  %v466_v3 = vld [vmem:[%s1277_s0 + $0x4] sm:$0xc]  ;;  %948 = vset.pattern.permute.xlu0 %v956_v29 }
   0x2   :  { %v378_v1 = vld [vmem:[%s1277_s0 + $0x4] sm:$0x3]  ;;  %404 = vrot.lane.b32.xlu0 %v402_v0, %s951_s24  ;;  %211 = vrot.lane.b32.xlu1 %v209_v2, %s951_s24  ;;  %v339_v4 = vld [vmem:[%s1277_s0] sm:$0xc]  ;;  %v794_v5 = vrot.slane %v466_v3, 10  ;;  %s953_s11 = smov 94  }
   0x3   :  { %380 = vrot.lane.b32.xlu2 %v378_v1, %s952_s25  ;;  %v384_v6 = vld [vmem:[%s1277_s0 + $0x4] sm:$0xc]  ;;  %v789_v7 = vrot.slane %v339_v4, 10  ;;  %v390_v9 = vld [vmem:[%s1277_s0 + $0x4] sm:$0x3]  ;;  %v461_v11 = vrot.slane %v402_v0, 6 }
   0x4   :  { %v792_v8 = vrot.slane %v384_v6, 10  ;;  %v396_v10 = vld [vmem:[%s1277_s0 + $0x4] sm:$0xc]  ;;  %v450_v12 = vrot.slane %v390_v9, 6  ;;  %v195_v14 = vld [vmem:[%s1277_s0] sm:$0x3] }
   0x5   :  { %v793_v13 = vrot.slane %v396_v10, 10  ;;  %v181_v15 = vld [vmem:[%s1277_s0] sm:$0x3]  ;;  %v188_v16 = vld [vmem:[%s1277_s0] sm:$0xc]  ;;  %v322_v17 = vrot.slane %v195_v14, 6 }
   0x6   :  { %v787_v18 = vrot.slane %v188_v16, 10  ;;  %v202_v19 = vld [vmem:[%s1277_s0] sm:$0xc]  ;;  %v333_v21 = vrot.slane %v209_v2, 6  ;;  %v165_v22 = vld [vmem:[%s1277_s0 + $0x4] sm:$0xc] }
   0x7   :  { %v788_v20 = vrot.slane %v202_v19, 10  ;;  %v1045_v23 = vld [vmem:[%s1277_s0 + $0x4] sm:$0xc]  ;;  %v158_v24 = vld [vmem:[%s1277_s0 + $0x4] sm:$0x3]  ;;  %v780_v25 = vrot.slane %v165_v22, 10 }
   0x8   :  { %v779_v26 = vrot.slane %v1045_v23, 10  ;;  %v160_v27 = vrot.slane %v158_v24, 6  ;;  %s954_s28 = smov 110   ;;  %v173_v28 = vld [vmem:[%s1277_s0 + $0x4] sm:$0x3]  ;;  %42 = vst [vmem:[#allocation2 + $0xa8] sm:$0xff] %v956_v29 }
   0x9   :  { %21 = vst [vmem:[#allocation2] sm:$0xff] %v956_v29  ;;  %v175_v30 = vrot.slane %v173_v28, 6  ;;  %s957_s6 = smov 108   ;;  %v369_v31 = vrot.slane %v181_v15, 6  ;;  %v310_v32 = vld [vmem:[%s1277_s0 + $0x4] sm:$0xc] }
   0xa   :  { %470 = vrot.lane.b32.xlu0 %v794_v5, %s951_s24  ;;  %343 = vrot.lane.b32.xlu1 %v789_v7, %s951_s24  ;;  %22 = vst [vmem:[#allocation2 + $0x8] sm:$0xff] %v956_v29  ;;  %v791_v33 = vrot.slane %v310_v32, 10  ;;  %v129_v34 = vld [vmem:[%s1277_s0] sm:$0xc]  ;;  %v1072_v35 = vld [vmem:[%s1277_s0] sm:$0x3] }
   0xb   :  { %386 = vrot.lane.b32.xlu2 %v384_v6, %s952_s25  ;;  %23 = vst [vmem:[#allocation2 + $0x10] sm:$0xff] %v956_v29  ;;  %v143_v36 = vld [vmem:[%s1277_s0 + $0x4] sm:$0x3]  ;;  %v785_v37 = vrot.slane %v129_v34, 10  ;;  %v136_v38 = vld [vmem:[%s1277_s0] sm:$0x3] }
   0xc   :  { %24 = vst [vmem:[#allocation2 + $0x18] sm:$0xff] %v956_v29  ;;  %v145_v39 = vrot.slane %v143_v36, 6  ;;  %v286_v41 = vld [vmem:[%s1277_s0] sm:$0xc]  ;;  %v281_v42 = vrot.slane %v136_v38, 6  ;;  %s958_s20 = smov 126  }
   0xd   :  { %25 = vst [vmem:[#allocation2 + $0x20] sm:$0xff] %v956_v29  ;;  %v786_v43 = vrot.slane %v286_v41, 10  ;;  %v1098_v44 = vld [vmem:[%s1277_s0 + $0x4] sm:$0xc]  ;;  %v100_v47 = vld [vmem:[%s1277_s0 + $0x4] sm:$0x3] }
   0xe   :  { %26 = vst [vmem:[#allocation2 + $0x28] sm:$0xff] %v956_v29  ;;  %v778_v46 = vrot.slane %v1098_v44, 10  ;;  %v102_v49 = vrot.slane %v100_v47, 6  ;;  %v115_v50 = vld [vmem:[%s1277_s0] sm:$0xc]  ;;  %s959_s30 = smov 124  }
   0xf   :  { %27 = vst [vmem:[#allocation2 + $0x30] sm:$0xff] %v956_v29  ;;  %v108_v51 = vld [vmem:[%s1277_s0] sm:$0x3]  ;;  %vm337_vm3 = vcmask 748546   ;;  %v784_v55 = vrot.slane %v115_v50, 10  ;;  %v270_v62 = vrot.slane %v1072_v35, 6 }
  0x10   :  { %28 = vst [vmem:[#allocation2 + $0x38] sm:$0xff] %v956_v29  ;;  %v258_v56 = vld [vmem:[%s1277_s0 + $0x4] sm:$0xc]  ;;  %vm200_vm4 = vcmask 762880   ;;  %v352_v3 = vrot.slane %v108_v51, 6  ;;  %vm207_vm5 = vcmask 764930  }
  0x11   :  { %29 = vst [vmem:[#allocation2 + $0x40] sm:$0xff] %v956_v29  ;;  %v790_v1 = vrot.slane %v258_v56, 10  ;;  %vm127_vm6 = vcmask 893952   ;;  %vm134_vm7 = vcmask 896002   ;;  %vm113_vm8 = vcmask 910336  }
  0x12   :  { %392 = vrot.lane.b32.xlu0 %v390_v9, %s953_s11  ;;  %398 = vrot.lane.b32.xlu1 %v396_v10, %s953_s11  ;;  %30 = vst [vmem:[#allocation2 + $0x48] sm:$0xff] %v956_v29  ;;  %v85_v10 = vld [vmem:[%s1277_s0 + $0x4] sm:$0x3]  ;;  %vm179_vm9 = vcmask 879618   ;;  %vm141_vm10 = vcmask 877568   ;;  %vm120_vm11 = vcmask 912386  }
  0x13   :  { %446 = vrot.lane.b32.xlu2 %v792_v8, %s952_s25  ;;  %31 = vst [vmem:[#allocation2 + $0x50] sm:$0xff] %v956_v29  ;;  %vm58_vm12 = vcmask 1025024   ;;  %vm72_vm13 = vcmask 1008640   ;;  %vm106_vm14 = vcmask 1010690   ;;  %vm65_vm15 = vcmask 1027074  }
  0x14   :  { %32 = vst [vmem:[#allocation2 + $0x58] sm:$0xff] %v956_v29 }
  0x15   :  { %33 = vst [vmem:[#allocation2 + $0x60] sm:$0xff] %v956_v29 }
  0x16   :  { %34 = vst [vmem:[#allocation2 + $0x68] sm:$0xff] %v956_v29 }
  0x17   :  { %35 = vst [vmem:[#allocation2 + $0x70] sm:$0xff] %v956_v29 }
  0x18   :  { %36 = vst [vmem:[#allocation2 + $0x78] sm:$0xff] %v956_v29 }
  0x19   :  { %37 = vst [vmem:[#allocation2 + $0x80] sm:$0xff] %v956_v29 }
  0x1a   :  { %451 = vrot.lane.b32.xlu0 %v450_v12, %s953_s11  ;;  %457 = vrot.lane.b32.xlu1 %v793_v13, %s953_s11  ;;  %38 = vst [vmem:[#allocation2 + $0x88] sm:$0xff] %v956_v29 }
  0x1b   :  { %462 = vrot.lane.b32.xlu2 %v461_v11, %s951_s24  ;;  %39 = vst [vmem:[#allocation2 + $0x90] sm:$0xff] %v956_v29 }
  0x1c   :  { %40 = vst [vmem:[#allocation2 + $0x98] sm:$0xff] %v956_v29 }
  0x1d   :  { %41 = vst [vmem:[#allocation2 + $0xa0] sm:$0xff] %v956_v29 }
  0x1e   :  { %43 = vst [vmem:[#allocation2 + $0xb0] sm:$0xff] %v956_v29 }
  0x1f   :  { %44 = vst [vmem:[#allocation2 + $0xb8] sm:$0xff] %v956_v29 }
  0x20   :  { %45 = vst [vmem:[#allocation2 + $0xc0] sm:$0xff] %v956_v29 }
  0x21   :  { %46 = vst [vmem:[#allocation2 + $0xc8] sm:$0xff] %v956_v29 }
  0x22   :  { %183 = vrot.lane.b32.xlu0 %v181_v15, %s952_s25  ;;  %190 = vrot.lane.b32.xlu1 %v188_v16, %s952_s25  ;;  %47 = vst [vmem:[#allocation2 + $0xd0] sm:$0xff] %v956_v29  ;;  %v87_v15 = vrot.slane %v85_v10, 6  ;;  %v67_v16 = vld [vmem:[%s1277_s0] sm:$0x3] }
  0x23   :  { %197 = vrot.lane.b32.xlu2 %v195_v14, %s953_s11  ;;  %48 = vst [vmem:[#allocation2 + $0xd8] sm:$0xff] %v956_v29 }
  0x29   :  { %v937_v61 = vld [vmem:[#allocation2 + $0xcc] sm:$0xf0]  ;;  %v895_v6 = vld [vmem:[#allocation2 + $0xd0] sm:$0xf0] }
  0x2a   :  { %204 = vrot.lane.b32.xlu0 %v202_v19, %s953_s11  ;;  %318 = vrot.lane.b32.xlu1 %v787_v18, %s952_s25  ;;  %v938_v57 = vld [vmem:[#allocation2 + $0xd4] sm:$0xf0]  ;;  %v903_v5 = vld [vmem:[#allocation2 + $0xd8] sm:$0xf0] }
  0x2b   :  { %323 = vrot.lane.b32.xlu2 %v322_v17, %s953_s11  ;;  %v237_v17 = vld [vmem:[%s1277_s0] sm:$0xc] }
  0x2c   :  { %v783_v18 = vrot.slane %v237_v17, 10 }
  0x32   :  { %329 = vrot.lane.b32.xlu0 %v788_v20, %s953_s11  ;;  %334 = vrot.lane.b32.xlu1 %v333_v21, %s951_s24 }
  0x33   :  { %440 = vrot.lane.b32.xlu2 %v339_v4, %s951_s24  ;;  %s955_s24 = smov 112  }
  0x3a   :  { %154 = vrot.lane.b32.xlu0 %v779_v26, %s955_s24  ;;  %161 = vrot.lane.b32.xlu1 %v160_v27, %s954_s28 }
  0x3b   :  { %169 = vrot.lane.b32.xlu2 %v780_v25, %s954_s28 }
  0x42   :  { %176 = vrot.lane.b32.xlu0 %v175_v30, %s957_s6  ;;  %298 = vrot.lane.b32.xlu1 %v158_v24, %s954_s28 }
  0x43   :  { %302 = vrot.lane.b32.xlu2 %v165_v22, %s954_s28 }
  0x4a   :  { %306 = vrot.lane.b32.xlu0 %v173_v28, %s957_s6  ;;  %312 = vrot.lane.b32.xlu1 %v310_v32, %s957_s6  ;;  %v53_v28 = vld [vmem:[%s1277_s0] sm:$0x3]  ;;  %v60_v32 = vld [vmem:[%s1277_s0] sm:$0xc] }
  0x4b   :  { %370 = vrot.lane.b32.xlu2 %v369_v31, %s952_s25 }
  0x52   :  { %432 = vrot.lane.b32.xlu0 %v791_v33, %s957_s6  ;;  %124 = vrot.lane.b32.xlu1 %v1072_v35, %s954_s28  ;;  %v221_v33 = vrot.slane %v53_v28, 6 }
  0x53   :  { %131 = vrot.lane.b32.xlu2 %v129_v34, %s954_s28  ;;  %v782_v34 = vrot.slane %v60_v32, 10 }
  0x5a   :  { %138 = vrot.lane.b32.xlu0 %v136_v38, %s957_s6  ;;  %146 = vrot.lane.b32.xlu1 %v145_v39, %s955_s24  ;;  %v232_v38 = vrot.slane %v67_v16, 6 }
  0x5b   :  { %277 = vrot.lane.b32.xlu2 %v785_v37, %s954_s28 }
  0x5d   :  { %v381_v40 = vpop.permute.xlu2 %380 }
  0x5e   :  { %383 = vst.msk [vmem:[#allocation2 + $0xa8] sm:$0x3] %vm186_vm0, %v381_v40 }
  0x62   :  { %282 = vrot.lane.b32.xlu0 %v281_v42, %s957_s6  ;;  %290 = vrot.lane.b32.xlu1 %v786_v43, %s957_s6 }
  0x63   :  { %294 = vrot.lane.b32.xlu2 %v1045_v23, %s955_s24 }
  0x65   :  { %v387_v45 = vpop.permute.xlu2 %386 }
  0x66   :  { %389 = vst.msk [vmem:[#allocation2 + $0xa8] sm:$0xc] %vm193_vm1, %v387_v45 }
  0x6a   :  { %361 = vrot.lane.b32.xlu0 %v143_v36, %s955_s24  ;;  %422 = vrot.lane.b32.xlu1 %v286_v41, %s957_s6 }
  0x6b   :  { %96 = vrot.lane.b32.xlu2 %v778_v46, %s958_s20 }
  0x6d   :  { %v447_v48 = vpop.permute.xlu2 %446  ;;  %v885_v22 = vld [vmem:[#allocation2 + $0xa8] sm:$0xf] }
  0x6e   :  { %449 = vst.msk [vmem:[#allocation2 + $0xac] sm:$0x3] %vm186_vm0, %v447_v48 }
  0x72   :  { %103 = vrot.lane.b32.xlu0 %v102_v49, %s959_s30  ;;  %110 = vrot.lane.b32.xlu1 %v108_v51, %s955_s24 }
  0x73   :  { %117 = vrot.lane.b32.xlu2 %v115_v50, %s955_s24 }
  0x74   :  { %v405_v52 = vpop.permute.xlu0 %404  ;;  %v212_v54 = vpop.permute.xlu1 %211 }
  0x75   :  { %v463_v53 = vpop.permute.xlu2 %462  ;;  %407 = vst.msk [vmem:[#allocation2 + $0xc8] sm:$0x3] %vm214_vm2, %v405_v52 }
  0x76   :  { %465 = vst.msk [vmem:[#allocation2 + $0xbc] sm:$0xc] %vm337_vm3, %v463_v53 }
  0x77   :  { %215 = vst.msk [vmem:[#allocation2 + $0xc0] sm:$0x3] %vm214_vm2, %v212_v54 }
  0x78   :  { %439 = vst.msk [vmem:[#allocation2 + $0x9c] sm:$0x3] %vm214_vm2, %v212_v54 }
  0x7a   :  { %254 = vrot.lane.b32.xlu0 %v100_v47, %s959_s30  ;;  %260 = vrot.lane.b32.xlu1 %v258_v56, %s959_s30 }
  0x7b   :  { %266 = vrot.lane.b32.xlu2 %v784_v55, %s955_s24 }
  0x7c   :  { %v471_v58 = vpop.permute.xlu0 %470  ;;  %v901_v60 = vld [vmem:[#allocation2 + $0xc8] sm:$0xf]  ;;  %v344_v63 = vpop.permute.xlu1 %343 }
  0x7d   :  { %v198_v59 = vpop.permute.xlu2 %197  ;;  %473 = vst.msk [vmem:[#allocation2 + $0xcc] sm:$0x3] %vm214_vm2, %v471_v58  ;;  %v902_v0 = vor.u32 %v938_v57, %v901_v60 }
  0x7e   :  { %346 = vst.msk [vmem:[#allocation2 + $0xc4] sm:$0x3] %vm214_vm2, %v344_v63  ;;  %v893_v2 = vld [vmem:[#allocation2 + $0xc0] sm:$0xf] }
  0x7f   :  { %201 = vst.msk [vmem:[#allocation2 + $0xb0] sm:$0x3] %vm200_vm4, %v198_v59  ;;  %674 = vmatpush.bf16.msra.mxu2 %v902_v0  ;;  %v894_v4 = vor.u32 %v937_v61, %v893_v2 }
  0x80   :  { %437 = vst.msk [vmem:[#allocation2 + $0x8c] sm:$0x3] %vm200_vm4, %v198_v59 }
  0x81   :  { %648 = vmatpush.bf16.msra.mxu0 %v894_v4 }
  0x82   :  { %271 = vrot.lane.b32.xlu0 %v270_v62, %s954_s28  ;;  %353 = vrot.lane.b32.xlu1 %v352_v3, %s955_s24 }
  0x83   :  { %414 = vrot.lane.b32.xlu2 %v790_v1, %s959_s30 }
  0x84   :  { %v393_v7 = vpop.permute.xlu0 %392  ;;  %v936_v9 = vld [vmem:[#allocation2 + $0xcc] sm:$0xf]  ;;  %v399_v11 = vpop.permute.xlu1 %398 }
  0x85   :  { %v324_v8 = vpop.permute.xlu2 %323  ;;  %395 = vst.msk [vmem:[#allocation2 + $0xb8] sm:$0x3] %vm200_vm4, %v393_v7  ;;  %v906_v12 = vor.u32 %v936_v9, %v903_v5  ;;  %v935_v13 = vld [vmem:[#allocation2 + $0xc4] sm:$0xf] }
  0x86   :  { %401 = vst.msk [vmem:[#allocation2 + $0xb8] sm:$0xc] %vm207_vm5, %v399_v11  ;;  %v898_v14 = vor.u32 %v935_v13, %v895_v6 }
  0x87   :  { %326 = vst.msk [vmem:[#allocation2 + $0xa4] sm:$0xc] %vm207_vm5, %v324_v8  ;;  %687 = vmatpush.bf16.msra.mxu3 %v906_v12 }
  0x88   :  { %375 = vst.msk [vmem:[#allocation2 + $0x88] sm:$0xc] %vm207_vm5, %v324_v8  ;;  %661 = vmatpush.bf16.msra.mxu1 %v898_v14 }
  0x8a   :  { %69 = vrot.lane.b32.xlu0 %v67_v16, %s959_s30  ;;  %88 = vrot.lane.b32.xlu1 %v87_v15, %s958_s20 }
  0x8b   :  { %241 = vrot.lane.b32.xlu2 %v783_v18, %s959_s30 }
  0x8c   :  { %v452_v19 = vpop.permute.xlu0 %451  ;;  %v458_v21 = vpop.permute.xlu1 %457 }
  0x8d   :  { %v441_v20 = vpop.permute.xlu2 %440  ;;  %454 = vst.msk [vmem:[#allocation2 + $0xac] sm:$0xc] %vm207_vm5, %v452_v19  ;;  %v934_v23 = vld [vmem:[#allocation2 + $0xb4] sm:$0xf0] }
  0x8e   :  { %460 = vst.msk [vmem:[#allocation2 + $0xbc] sm:$0x3] %vm200_vm4, %v458_v21  ;;  %v886_v24 = vor.u32 %v934_v23, %v885_v22  ;;  %v79_v23 = vld [vmem:[%s1277_s0 + $0x4] sm:$0xc] }
  0x8f   :  { %443 = vst.msk [vmem:[#allocation2 + $0x9c] sm:$0xc] %vm337_vm3, %v441_v20 }
  0x90   :  { %675 = vmatpush.bf16.msra.mxu2 %v886_v24  ;;  %348 = vst [vmem:[#allocation2 + $0x8] sm:$0xc] %v79_v23 }
  0x91   :  { %245 = vst [vmem:[#allocation2 + $0x24] sm:$0xc] %v79_v23 }
  0x92   :  { %246 = vrot.lane.b32.xlu0 %v85_v10, %s958_s20  ;;  %250 = vrot.lane.b32.xlu1 %v1098_v44, %s958_s20 }
  0x93   :  { %55 = vrot.lane.b32.xlu2 %v53_v28, %s958_s20 }
  0x94   :  { %v184_v25 = vpop.permute.xlu0 %183  ;;  %v932_v27 = vld [vmem:[#allocation2 + $0xac] sm:$0xf]  ;;  %v191_v29 = vpop.permute.xlu1 %190 }
  0x95   :  { %v170_v26 = vpop.permute.xlu2 %169  ;;  %187 = vst.msk [vmem:[#allocation2 + $0xa0] sm:$0x3] %vm186_vm0, %v184_v25  ;;  %v887_v30 = vld [vmem:[#allocation2 + $0xb8] sm:$0xf0] }
  0x96   :  { %194 = vst.msk [vmem:[#allocation2 + $0xa0] sm:$0xc] %vm193_vm1, %v191_v29  ;;  %v890_v31 = vor.u32 %v932_v27, %v887_v30  ;;  %v871_v46 = vld [vmem:[#allocation2 + $0x98] sm:$0xf0]  ;;  %v81_v27 = vrot.slane %v79_v23, 6 }
  0x97   :  { %436 = vst.msk [vmem:[#allocation2 + $0x7c] sm:$0xc] %vm193_vm1, %v191_v29  ;;  %v74_v29 = vld [vmem:[%s1277_s0 + $0x4] sm:$0x3] }
  0x98   :  { %172 = vst.msk [vmem:[#allocation2 + $0x90] sm:$0x3] %vm127_vm6, %v170_v26  ;;  %688 = vmatpush.bf16.msra.mxu3 %v890_v31  ;;  %v82_v31 = vrot.slane %v81_v27, 4  ;;  %v699_v27 = vld [vmem:[%s1279_s4] sm:$0xf] }
  0x99   :  { %428 = vst.msk [vmem:[#allocation2 + $0x6c] sm:$0x3] %vm127_vm6, %v170_v26 }
  0x9a   :  { %62 = vrot.lane.b32.xlu0 %v60_v32, %s958_s20  ;;  %222 = vrot.lane.b32.xlu1 %v221_v33, %s958_s20  ;;  %84 = vst [vmem:[#allocation2 + $0x30] sm:$0x3] %v82_v31  ;;  %v76_v33 = vrot.slane %v74_v29, 6 }
  0x9b   :  { %228 = vrot.lane.b32.xlu2 %v782_v34, %s958_s20  ;;  %347 = vst [vmem:[#allocation2 + $0x8] sm:$0x3] %v74_v29 }
  0x9c   :  { %v205_v35 = vpop.permute.xlu0 %204  ;;  %v319_v37 = vpop.permute.xlu1 %318  ;;  %408 = vst [vmem:[#allocation2 + $0xc] sm:$0x3] %v82_v31 }
  0x9d   :  { %v303_v36 = vpop.permute.xlu2 %302  ;;  %208 = vst.msk [vmem:[#allocation2 + $0xb0] sm:$0xc] %vm207_vm5, %v205_v35  ;;  %v877_v41 = vld [vmem:[#allocation2 + $0xa0] sm:$0xf] }
  0x9e   :  { %321 = vst.msk [vmem:[#allocation2 + $0xa4] sm:$0x3] %vm186_vm0, %v319_v37 }
  0x9f   :  { %374 = vst.msk [vmem:[#allocation2 + $0x88] sm:$0x3] %vm186_vm0, %v319_v37  ;;  %vm643_vm0 = vcmask 916480  }
  0xa0   :  { %438 = vst.msk [vmem:[#allocation2 + $0x8c] sm:$0xc] %vm207_vm5, %v205_v35 }
  0xa1   :  { %305 = vst.msk [vmem:[#allocation2 + $0x84] sm:$0xc] %vm134_vm7, %v303_v36 }
  0xa2   :  { %367 = vst.msk [vmem:[#allocation2 + $0x68] sm:$0xc] %vm134_vm7, %v303_v36  ;;  %233 = vrot.lane.b32.xlu0 %v232_v38, %s959_s30 }
  0xa3   :  { %78 = vst [vmem:[#allocation2 + $0x20] sm:$0xc] %v76_v33 }
  0xa4   :  { %v330_v39 = vpop.permute.xlu0 %329  ;;  %v933_v42 = vld [vmem:[#allocation2 + $0xac] sm:$0xf0]  ;;  %v335_v43 = vpop.permute.xlu1 %334 }
  0xa5   :  { %v371_v40 = vpop.permute.xlu2 %370  ;;  %332 = vst.msk [vmem:[#allocation2 + $0xb4] sm:$0x3] %vm200_vm4, %v330_v39  ;;  %v878_v44 = vor.u32 %v933_v42, %v877_v41  ;;  %v931_v48 = vld [vmem:[#allocation2 + $0xa4] sm:$0xf] }
  0xa6   :  { %338 = vst.msk [vmem:[#allocation2 + $0xb4] sm:$0xc] %vm337_vm3, %v335_v43  ;;  %v869_v53 = vld [vmem:[#allocation2 + $0x88] sm:$0xf] }
  0xa7   :  { %377 = vst.msk [vmem:[#allocation2 + $0x98] sm:$0xc] %vm337_vm3, %v335_v43  ;;  %649 = vmatpush.bf16.msra.mxu0 %v878_v44  ;;  %v928_v45 = vld [vmem:[#allocation2 + $0x8c] sm:$0xf] }
  0xa8   :  { %376 = vst.msk [vmem:[#allocation2 + $0x98] sm:$0x3] %vm200_vm4, %v330_v39  ;;  %v874_v47 = vor.u32 %v928_v45, %v871_v46 }
  0xa9   :  { %373 = vst.msk [vmem:[#allocation2 + $0x78] sm:$0xc] %vm193_vm1, %v371_v40 }
  0xaa   :  { %689 = vmatpush.bf16.msra.mxu3 %v874_v47 }
  0xac   :  { %v155_v49 = vpop.permute.xlu0 %154  ;;  %v162_v51 = vpop.permute.xlu1 %161 }
  0xad   :  { %v132_v50 = vpop.permute.xlu2 %131  ;;  %157 = vst.msk [vmem:[#allocation2 + $0x80] sm:$0x3] %vm113_vm8, %v155_v49  ;;  %v879_v52 = vld [vmem:[#allocation2 + $0xb0] sm:$0xf0] }
  0xae   :  { %164 = vst.msk [vmem:[#allocation2 + $0x80] sm:$0xc] %vm134_vm7, %v162_v51  ;;  %v882_v54 = vor.u32 %v931_v48, %v879_v52  ;;  %v49_v52 = vld [vmem:[%s1277_s0] sm:$0x3] }
  0xaf   :  { %427 = vst.msk [vmem:[#allocation2 + $0x5c] sm:$0xc] %vm134_vm7, %v162_v51  ;;  %v930_v55 = vld [vmem:[#allocation2 + $0x94] sm:$0xf0] }
  0xb0   :  { %426 = vst.msk [vmem:[#allocation2 + $0x5c] sm:$0x3] %vm113_vm8, %v155_v49  ;;  %662 = vmatpush.bf16.msra.mxu1 %v882_v54  ;;  %v870_v56 = vor.u32 %v930_v55, %v869_v53  ;;  %v51_v53 = vld [vmem:[%s1277_s0] sm:$0xc] }
  0xb1   :  { %135 = vst.msk [vmem:[#allocation2 + $0x60] sm:$0xc] %vm134_vm7, %v132_v50 }
  0xb2   :  { %420 = vst.msk [vmem:[#allocation2 + $0x3c] sm:$0xc] %vm134_vm7, %v132_v50  ;;  %676 = vmatpush.bf16.msra.mxu2 %v870_v56  ;;  %v781_v56 = vrot.slane %v51_v53, 10 }
  0xb3   :  { %50 = vst [vmem:[#allocation2] sm:$0x3] %v49_v52 }
  0xb4   :  { %v177_v57 = vpop.permute.xlu0 %176  ;;  %v299_v59 = vpop.permute.xlu1 %298  ;;  %52 = vst [vmem:[#allocation2] sm:$0xc] %v51_v53 }
  0xb5   :  { %v278_v58 = vpop.permute.xlu2 %277  ;;  %180 = vst.msk [vmem:[#allocation2 + $0x90] sm:$0xc] %vm179_vm9, %v177_v57  ;;  %v861_v62 = vld [vmem:[#allocation2 + $0x80] sm:$0xf] }
  0xb6   :  { %301 = vst.msk [vmem:[#allocation2 + $0x84] sm:$0x3] %vm127_vm6, %v299_v59 }
  0xb7   :  { %366 = vst.msk [vmem:[#allocation2 + $0x68] sm:$0x3] %vm127_vm6, %v299_v59  ;;  %v839_v40 = vld [vmem:[#allocation2 + $0x58] sm:$0xf0] }
  0xb8   :  { %429 = vst.msk [vmem:[#allocation2 + $0x6c] sm:$0xc] %vm179_vm9, %v177_v57 }
  0xb9   :  { %280 = vst.msk [vmem:[#allocation2 + $0x64] sm:$0x3] %vm127_vm6, %v278_v58 }
  0xba   :  { %359 = vst.msk [vmem:[#allocation2 + $0x48] sm:$0x3] %vm127_vm6, %v278_v58 }
  0xbb   :  { %220 = vst [vmem:[#allocation2 + $0x4] sm:$0x3] %v781_v56 }
  0xbc   :  { %v307_v60 = vpop.permute.xlu0 %306  ;;  %v929_v63 = vld [vmem:[#allocation2 + $0x8c] sm:$0xf0]  ;;  %v313_v0 = vpop.permute.xlu1 %312 }
  0xbd   :  { %v295_v61 = vpop.permute.xlu2 %294  ;;  %309 = vst.msk [vmem:[#allocation2 + $0x94] sm:$0x3] %vm141_vm10, %v307_v60  ;;  %v862_v1 = vor.u32 %v929_v63, %v861_v62  ;;  %v927_v2 = vld [vmem:[#allocation2 + $0x84] sm:$0xf] }
  0xbe   :  { %315 = vst.msk [vmem:[#allocation2 + $0x94] sm:$0xc] %vm179_vm9, %v313_v0  ;;  %v853_v5 = vld [vmem:[#allocation2 + $0x68] sm:$0xf] }
  0xbf   :  { %368 = vst.msk [vmem:[#allocation2 + $0x78] sm:$0x3] %vm141_vm10, %v307_v60  ;;  %650 = vmatpush.bf16.msra.mxu0 %v862_v1  ;;  %v924_v13 = vld [vmem:[#allocation2 + $0x6c] sm:$0xf] }
  0xc0   :  { %297 = vst.msk [vmem:[#allocation2 + $0x74] sm:$0xc] %vm120_vm11, %v295_v61 }
  0xc1   :  { %365 = vst.msk [vmem:[#allocation2 + $0x58] sm:$0xc] %vm120_vm11, %v295_v61 }
  0xc4   :  { %v433_v3 = vpop.permute.xlu0 %432  ;;  %v125_v6 = vpop.permute.xlu1 %124 }
  0xc5   :  { %v97_v4 = vpop.permute.xlu2 %96  ;;  %435 = vst.msk [vmem:[#allocation2 + $0x7c] sm:$0x3] %vm141_vm10, %v433_v3  ;;  %v863_v7 = vld [vmem:[#allocation2 + $0x90] sm:$0xf0] }
  0xc6   :  { %128 = vst.msk [vmem:[#allocation2 + $0x60] sm:$0x3] %vm127_vm6, %v125_v6  ;;  %v866_v8 = vor.u32 %v927_v2, %v863_v7  ;;  %v926_v9 = vld [vmem:[#allocation2 + $0x74] sm:$0xf0] }
  0xc7   :  { %419 = vst.msk [vmem:[#allocation2 + $0x3c] sm:$0x3] %vm127_vm6, %v125_v6  ;;  %v854_v10 = vor.u32 %v926_v9, %v853_v5 }
  0xc8   :  { %99 = vst.msk [vmem:[#allocation2 + $0x40] sm:$0x3] %vm58_vm12, %v97_v4  ;;  %663 = vmatpush.bf16.msra.mxu1 %v866_v8 }
  0xc9   :  { %410 = vst.msk [vmem:[#allocation2 + $0x1c] sm:$0x3] %vm58_vm12, %v97_v4  ;;  %677 = vmatpush.bf16.msra.mxu2 %v854_v10 }
  0xcc   :  { %v139_v11 = vpop.permute.xlu0 %138  ;;  %v855_v14 = vld [vmem:[#allocation2 + $0x78] sm:$0xf0]  ;;  %v147_v15 = vpop.permute.xlu1 %146 }
  0xcd   :  { %v118_v12 = vpop.permute.xlu2 %117  ;;  %142 = vst.msk [vmem:[#allocation2 + $0x70] sm:$0x3] %vm141_vm10, %v139_v11  ;;  %v858_v16 = vor.u32 %v924_v13, %v855_v14  ;;  %v845_v19 = vld [vmem:[#allocation2 + $0x60] sm:$0xf]  ;;  %v805_v14 = vld [vmem:[#allocation2 + $0x8] sm:$0xf] }
  0xce   :  { %421 = vst.msk [vmem:[#allocation2 + $0x4c] sm:$0x3] %vm141_vm10, %v139_v11  ;;  %v823_v44 = vld [vmem:[#allocation2 + $0x38] sm:$0xf0]  ;;  %v474_v11 = vld [vmem:[%s1278_s1] sm:$0xf] }
  0xcf   :  { %149 = vst.msk [vmem:[#allocation2 + $0x70] sm:$0xc] %vm120_vm11, %v147_v15  ;;  %690 = vmatpush.bf16.msra.mxu3 %v858_v16 }
  0xd0   :  { %121 = vst.msk [vmem:[#allocation2 + $0x50] sm:$0xc] %vm120_vm11, %v118_v12 }
  0xd1   :  { %418 = vst.msk [vmem:[#allocation2 + $0x2c] sm:$0xc] %vm120_vm11, %v118_v12 }
  0xd4   :  { %v283_v17 = vpop.permute.xlu0 %282  ;;  %v291_v20 = vpop.permute.xlu1 %290 }
  0xd5   :  { %v267_v18 = vpop.permute.xlu2 %266  ;;  %285 = vst.msk [vmem:[#allocation2 + $0x64] sm:$0xc] %vm179_vm9, %v283_v17 }
  0xd6   :  { %360 = vst.msk [vmem:[#allocation2 + $0x48] sm:$0xc] %vm179_vm9, %v283_v17  ;;  %v925_v21 = vld [vmem:[#allocation2 + $0x6c] sm:$0xf0] }
  0xd7   :  { %293 = vst.msk [vmem:[#allocation2 + $0x74] sm:$0x3] %vm141_vm10, %v291_v20  ;;  %v846_v22 = vor.u32 %v925_v21, %v845_v19  ;;  %v797_v19 = vld [vmem:[#allocation2] sm:$0xf] }
  0xd8   :  { %269 = vst.msk [vmem:[#allocation2 + $0x54] sm:$0x3] %vm113_vm8, %v267_v18 }
  0xd9   :  { %357 = vst.msk [vmem:[#allocation2 + $0x38] sm:$0x3] %vm113_vm8, %v267_v18  ;;  %651 = vmatpush.bf16.msra.mxu0 %v846_v22 }
  0xdc   :  { %v362_v24 = vpop.permute.xlu0 %361  ;;  %v923_v26 = vld [vmem:[#allocation2 + $0x64] sm:$0xf]  ;;  %v423_v28 = vpop.permute.xlu1 %422 }
  0xdd   :  { %v415_v25 = vpop.permute.xlu2 %414  ;;  %364 = vst.msk [vmem:[#allocation2 + $0x58] sm:$0x3] %vm113_vm8, %v362_v24  ;;  %v837_v35 = vld [vmem:[#allocation2 + $0x48] sm:$0xf] }
  0xde   :  { %425 = vst.msk [vmem:[#allocation2 + $0x4c] sm:$0xc] %vm179_vm9, %v423_v28  ;;  %v847_v30 = vld [vmem:[#allocation2 + $0x70] sm:$0xf0] }
  0xdf   :  { %417 = vst.msk [vmem:[#allocation2 + $0x2c] sm:$0x3] %vm72_vm13, %v415_v25  ;;  %v850_v32 = vor.u32 %v923_v26, %v847_v30  ;;  %v701_v30 = vperm.slane %v699_v27, 0 }
  0xe1   :  { %664 = vmatpush.bf16.msra.mxu1 %v850_v32  ;;  %v703_v32 = vperm.slane %v699_v27, 2 }
  0xe4   :  { %v104_v34 = vpop.permute.xlu0 %103  ;;  %v922_v36 = vld [vmem:[#allocation2 + $0x54] sm:$0xf0]  ;;  %v111_v37 = vpop.permute.xlu1 %110 }
  0xe5   :  { %107 = vst.msk [vmem:[#allocation2 + $0x40] sm:$0xc] %vm106_vm14, %v104_v34  ;;  %v838_v38 = vor.u32 %v922_v36, %v837_v35  ;;  %v920_v39 = vld [vmem:[#allocation2 + $0x4c] sm:$0xf]  ;;  %v242_v43 = vpop.permute.xlu2 %241  ;;  %v702_v35 = vperm.slane %v699_v27, 1 }
  0xe6   :  { %114 = vst.msk [vmem:[#allocation2 + $0x50] sm:$0x3] %vm113_vm8, %v111_v37  ;;  %v842_v41 = vor.u32 %v920_v39, %v839_v40  ;;  %v916_v42 = vld [vmem:[#allocation2 + $0x2c] sm:$0xf] }
  0xe7   :  { %411 = vst.msk [vmem:[#allocation2 + $0x1c] sm:$0xc] %vm106_vm14, %v104_v34  ;;  %678 = vmatpush.bf16.msra.mxu2 %v838_v38  ;;  %v826_v45 = vor.u32 %v916_v42, %v823_v44  ;;  %v704_v34 = vperm.slane %v699_v27, 3 }
  0xe8   :  { %691 = vmatpush.bf16.msra.mxu3 %v842_v41  ;;  %244 = vst.msk [vmem:[#allocation2 + $0x24] sm:$0x3] %vm72_vm13, %v242_v43 }
  0xec   :  { %692 = vmatpush.bf16.msra.mxu3 %v826_v45  ;;  %v255_v46 = vpop.permute.xlu0 %254  ;;  %v829_v47 = vld [vmem:[#allocation2 + $0x40] sm:$0xf]  ;;  %v261_v48 = vpop.permute.xlu1 %260 }
  0xed   :  { %257 = vst.msk [vmem:[#allocation2 + $0x44] sm:$0x3] %vm72_vm13, %v255_v46  ;;  %v921_v49 = vld [vmem:[#allocation2 + $0x4c] sm:$0xf0]  ;;  %v56_v51 = vpop.permute.xlu2 %55 }
  0xee   :  { %263 = vst.msk [vmem:[#allocation2 + $0x44] sm:$0xc] %vm106_vm14, %v261_v48  ;;  %v830_v50 = vor.u32 %v921_v49, %v829_v47  ;;  %v807_v8 = vld [vmem:[#allocation2 + $0x18] sm:$0xf0] }
  0xef   :  { %351 = vst.msk [vmem:[#allocation2 + $0x28] sm:$0x3] %vm72_vm13, %v255_v46  ;;  %v915_v10 = vld [vmem:[#allocation2 + $0x24] sm:$0xf] }
  0xf0   :  { %652 = vmatpush.bf16.msra.mxu0 %v830_v50  ;;  %59 = vst.msk [vmem:[#allocation2 + $0x10] sm:$0x3] %vm58_vm12, %v56_v51 }
  0xf4   :  { %v272_v54 = vpop.permute.xlu0 %271  ;;  %v354_v55 = vpop.permute.xlu1 %353 }
  0xf5   :  { %274 = vst.msk [vmem:[#allocation2 + $0x54] sm:$0xc] %vm134_vm7, %v272_v54  ;;  %v229_v57 = vpop.permute.xlu2 %228  ;;  %v919_v59 = vld [vmem:[#allocation2 + $0x44] sm:$0xf] }
  0xf6   :  { %356 = vst.msk [vmem:[#allocation2 + $0x28] sm:$0xc] %vm120_vm11, %v354_v55 }
  0xf7   :  { %358 = vst.msk [vmem:[#allocation2 + $0x38] sm:$0xc] %vm134_vm7, %v272_v54 }
  0xf8   :  { %231 = vst.msk [vmem:[#allocation2 + $0x14] sm:$0x3] %vm58_vm12, %v229_v57 }
  0xfc   :  { %v70_v58 = vpop.permute.xlu0 %69  ;;  %v831_v60 = vld [vmem:[#allocation2 + $0x50] sm:$0xf0]  ;;  %v89_v61 = vpop.permute.xlu1 %88 }
  0xfd   :  { %73 = vst.msk [vmem:[#allocation2 + $0x20] sm:$0x3] %vm72_vm13, %v70_v58  ;;  %v834_v62 = vor.u32 %v919_v59, %v831_v60  ;;  %v821_v63 = vld [vmem:[#allocation2 + $0x28] sm:$0xf] }
  0xfe   :  { %91 = vst.msk [vmem:[#allocation2 + $0x30] sm:$0xc] %vm65_vm15, %v89_v61  ;;  %v918_v0 = vld [vmem:[#allocation2 + $0x34] sm:$0xf0] }
  0xff   :  { %409 = vst.msk [vmem:[#allocation2 + $0xc] sm:$0xc] %vm65_vm15, %v89_v61  ;;  %665 = vmatpush.bf16.msra.mxu1 %v834_v62  ;;  %v822_v1 = vor.u32 %v918_v0, %v821_v63 }
 0x101   :  { %679 = vmatpush.bf16.msra.mxu2 %v822_v1 }
 0x104   :  { %v247_v2 = vpop.permute.xlu0 %246  ;;  %v813_v3 = vld [vmem:[#allocation2 + $0x20] sm:$0xf]  ;;  %v251_v4 = vpop.permute.xlu1 %250 }
 0x105   :  { %249 = vst.msk [vmem:[#allocation2 + $0x34] sm:$0x3] %vm58_vm12, %v247_v2  ;;  %v917_v5 = vld [vmem:[#allocation2 + $0x2c] sm:$0xf0] }
 0x106   :  { %253 = vst.msk [vmem:[#allocation2 + $0x34] sm:$0xc] %vm65_vm15, %v251_v4  ;;  %v814_v6 = vor.u32 %v917_v5, %v813_v3  ;;  %v912_v7 = vld [vmem:[#allocation2 + $0xc] sm:$0xf] }
 0x107   :  { %350 = vst.msk [vmem:[#allocation2 + $0x18] sm:$0xc] %vm65_vm15, %v251_v4  ;;  %v810_v9 = vor.u32 %v912_v7, %v807_v8  ;;  %v745_v7 = vld [vmem:[%s1281_s3] sm:$0xff] }
 0x108   :  { %349 = vst.msk [vmem:[#allocation2 + $0x18] sm:$0x3] %vm58_vm12, %v247_v2  ;;  %653 = vmatpush.bf16.msra.mxu0 %v814_v6  ;;  %v732_v2 = vld [vmem:[%s1280_s2] sm:$0xff] }
 0x109   :  { %693 = vmatpush.bf16.msra.mxu3 %v810_v9 }
 0x10c   :  { %v63_v12 = vpop.permute.xlu0 %62  ;;  %910 = vmatmul.msk.bf16.vlgmr.msra.gmra.mxu3 %vm643_vm0, %v474_v11  ;;  %v223_v15 = vpop.permute.xlu1 %222 }
 0x10d   :  { %66 = vst.msk [vmem:[#allocation2 + $0x10] sm:$0xc] %vm65_vm15, %v63_v12  ;;  %v815_v13 = vld [vmem:[#allocation2 + $0x30] sm:$0xf0] }
 0x10e   :  { %v818_v16 = vor.u32 %v915_v10, %v815_v13  ;;  %225 = vst.msk [vmem:[#allocation2 + $0x4] sm:$0xc] %vm65_vm15, %v223_v15 }
 0x10f   :  { %v914_v17 = vld [vmem:[#allocation2 + $0x14] sm:$0xf0] }
 0x110   :  { %666 = vmatpush.bf16.msra.mxu1 %v818_v16  ;;  %v806_v18 = vor.u32 %v914_v17, %v805_v14 }
 0x112   :  { %680 = vmatpush.bf16.msra.mxu2 %v806_v18 }
 0x114   :  { %v234_v20 = vpop.permute.xlu0 %233  ;;  %v913_v21 = vld [vmem:[#allocation2 + $0xc] sm:$0xf0] }
 0x115   :  { %236 = vst.msk [vmem:[#allocation2 + $0x14] sm:$0xc] %vm106_vm14, %v234_v20  ;;  %909 = vmatmul.msk.bf16.vlgmr.msra.gmra.mxu2 %vm643_vm0, %v474_v11  ;;  %v798_v22 = vor.u32 %v913_v21, %v797_v19  ;;  %v911_v23 = vld [vmem:[#allocation2 + $0x4] sm:$0xf] }
 0x117   :  { %654 = vmatpush.bf16.msra.mxu0 %v798_v22 }
 0x11a   :  { %907 = vmatmul.msk.bf16.vlgmr.msra.gmra.mxu0 %vm643_vm0, %v474_v11 }
 0x11c   :  { %v799_v24 = vld [vmem:[#allocation2 + $0x10] sm:$0xf0] }
 0x11d   :  { %v802_v25 = vor.u32 %v911_v23, %v799_v24 }
 0x11f   :  { %667 = vmatpush.bf16.msra.mxu1 %v802_v25 }
 0x122   :  { %908 = vmatmul.msk.bf16.vlgmr.msra.gmra.mxu1 %vm643_vm0, %v474_v11 }
 0x18f   :  { %v1261_v26 = vpop.f32.mrf.mxu3 }
 0x190   :  { %v712_v40 = vmul.f32 %v704_v34, %v1261_v26 }
 0x192   :  { %v722_v47 = vmul.f32 %v712_v40, %v712_v40 }
 0x197   :  { %v656_v28 = vpop.f32.mrf.mxu0  ;;  %v697_v29 = vpop.f32.mrf.mxu3 }
 0x198   :  { %v682_v31 = vpop.f32.mrf.mxu2  ;;  %v709_v33 = vmul.f32 %v701_v30, %v656_v28 }
 0x199   :  { %v711_v36 = vmul.f32 %v703_v32, %v682_v31 }
 0x19a   :  { %v719_v39 = vmul.f32 %v709_v33, %v709_v33 }
 0x19b   :  { %v721_v43 = vmul.f32 %v711_v36, %v711_v36 }
 0x19f   :  { %v658_v37 = vpop.f32.mrf.mxu0  ;;  %v669_v38 = vpop.f32.mrf.mxu1 }
 0x1a0   :  { %v710_v41 = vmul.f32 %v702_v35, %v669_v38  ;;  %v684_v42 = vpop.f32.mrf.mxu2 }
 0x1a2   :  { %v713_v44 = vadd.f32 %v710_v41, %v709_v33  ;;  %v720_v45 = vmul.f32 %v710_v41, %v710_v41 }
 0x1a4   :  { %v714_v46 = vadd.f32 %v713_v44, %v711_v36  ;;  %v723_v48 = vadd.f32 %v720_v45, %v719_v39 }
 0x1a6   :  { %v715_v49 = vadd.f32 %v714_v46, %v712_v40  ;;  %v724_v50 = vadd.f32 %v723_v48, %v721_v43 }
 0x1a7   :  { %v671_v51 = vpop.f32.mrf.mxu1 }
 0x1a8   :  { %716 = vadd.xlane.f32.xlu1 %v715_v49  ;;  %v725_v52 = vadd.f32 %v724_v50, %v722_v47 }
 0x1aa   :  { %726 = vadd.xlane.f32.xlu2 %v725_v52 }
 0x21b   :  { %v717_v53 = vpop.xlane.xlu1 %716 }
 0x21c   :  { %v718_v54 = vmul.f32 0.0034722222, %v717_v53 }
 0x21d   :  { %v727_v55 = vpop.xlane.xlu2 %726 }
 0x21e   :  { %v729_v56 = vmul.f32 %v718_v54, %v718_v54  ;;  %v728_v57 = vmul.f32 0.0034722222, %v727_v55 }
 0x220   :  { %v730_v58 = vsub.f32 %v728_v57, %v729_v56 }
 0x222   :  { %v731_v59 = vmax.f32 %v730_v58, 0.0 }
 0x224   :  { %v733_v60 = vadd.f32 1e-05, %v731_v59 }
 0x226   :  { %949 = vrsqrt.f32 %v733_v60  ;;  %vm740_vm2 = vweird.f32 %v733_v60 }
 0x22c   :  { %v950_v61 = vpop.eup %949 }
 0x22d   :  { %v735_v62 = vmul.f32 %v950_v61, %v733_v60  ;;  %vm741_vm1 = vweird.f32 %v950_v61 }
 0x22e   :  { %vm742_vm3 = vmor %vm740_vm2, %vm741_vm1 }
 0x22f   :  { %v736_v63 = vmul.f32 %v950_v61, %v735_v62 }
 0x231   :  { %v737_v0 = vmul.f32 0.5, %v736_v63 }
 0x233   :  { %v738_v1 = vsub.f32 1.5, %v737_v0 }
 0x235   :  { %v739_v3 = vmul.f32 %v950_v61, %v738_v1 }
 0x237   :  { %v743_v4 = vsel %vm742_vm3, %v950_v61, %v739_v3 }
 0x238   :  { %v744_v5 = vmul.f32 %v743_v4, %v732_v2 }
 0x23a   :  { %750 = vperm.xlu0 %948, %v744_v5   ;;  %v746_v6 = vmul.f32 %v744_v5, %v718_v54 }
 0x23c   :  { %v747_v8 = vsub.f32 %v745_v7, %v746_v6 }
 0x242   :  { %759 = vperm.xlu0 %948, %v747_v8  }
 0x2ac   :  { %v751_v9 = vpop.permute.xlu0 %750 }
 0x2ad   :  { %v753_v10 = vmul.f32 %v751_v9, %v656_v28  ;;  %v754_v11 = vmul.f32 %v751_v9, %v669_v38  ;;  %v755_v12 = vmul.f32 %v751_v9, %v682_v31  ;;  %v756_v14 = vmul.f32 %v751_v9, %v1261_v26 }
 0x2b4   :  { %v760_v13 = vpop.permute.xlu0 %759 }
 0x2b5   :  { %v762_v15 = vadd.f32 %v760_v13, %v753_v10  ;;  %v763_v16 = vadd.f32 %v760_v13, %v754_v11  ;;  %v764_v17 = vadd.f32 %v760_v13, %v755_v12  ;;  %v765_v18 = vadd.f32 %v760_v13, %v756_v14 }
 0x2b7   :  { %v766_v19 = vmax.f32 %v762_v15, 0.0  ;;  %v767_v20 = vmax.f32 %v763_v16, 0.0  ;;  %v768_v21 = vmax.f32 %v764_v17, 0.0  ;;  %v769_v23 = vmax.f32 %v765_v18, 0.0 }
 0x2b9   :  { %v770_v22 = vmax.f32 %v766_v19, %v767_v20 }
 0x2bb   :  { %v771_v24 = vmax.f32 %v770_v22, %v768_v21 }
 0x2bd   :  { %v772_v25 = vmax.f32 %v771_v24, %v769_v23 }
 0x2bf   :  { %773 = vst [vmem:[%s1282_s5] sm:$0xff] %v772_v25 }

</bundles_post_ra>
